<compile_context>
chip_gen: v7x
topology: tpu7x:2x2x1
jax: 0.10.0
libtpu: 0.0.40
codegen_flags: <defaults>
</compile_context>

<pallas_src>
import math
from functools import partial

import jax
import jax.numpy as jnp
import numpy as np
from jax.experimental import pallas as pl
from jax.experimental.pallas import tpu as pltpu

N_TCNS = 6
C_PAD = 16                # output channels padded 12 -> 16 (sublane multiple of 8)
CHUNK_TARGET = 512        # in-kernel chunk width (lanes) — keeps per-layer live set in vregs
TARGET_TILE_LANES = 8192  # per-grid-step DMA tile width (lanes)


def decoder_kernel(x_ref, w0_ref, w_ref, b_ref, a_ref, o_ref, *, width, cpad, chunk):
    """One grid step over a [*, TILE] slab of activations.

    x_ref : [cin0, TILE] f32 VMEM   input activations (channels on sublanes, flat N*H*W on lanes)
    w0_ref: [3, cpad, cin0]         layer-0 tap weights (kw, co, ci)
    w_ref : [L-1, 3, cpad, cpad]    layers 1..5 tap weights
    b_ref : [L, cpad, 1]            biases (broadcast along lanes)
    a_ref : [L] f32 SMEM            PReLU slopes
    o_ref : [cpad, TILE] f32 VMEM
    """
    tile = x_ref.shape[-1]
    n_chunks = tile // chunk

    # Hoisted multiplicative boundary masks (computed once per grid step).
    # Chunk starts are multiples of `width`, so lane_index % width is the true w.
    wpos = jax.lax.broadcasted_iota(jnp.int32, (cpad, chunk), 1) % width
    ml = (wpos != 0).astype(jnp.float32)            # tap kw=0 needs x[w-1]
    mr = (wpos != (width - 1)).astype(jnp.float32)  # tap kw=2 needs x[w+1]

    def layer_fn(tap, bias, alpha, h):
        # Three accumulating [cpad, ci] @ [ci, chunk] dots — no [3*cpad, chunk] slab.
        z1 = jnp.dot(tap(1), h, preferred_element_type=jnp.float32)
        z0 = jnp.dot(tap(0), h, preferred_element_type=jnp.float32)
        z2 = jnp.dot(tap(2), h, preferred_element_type=jnp.float32)
        # Width shift commutes with the channel matmul: realign tap results on the XLU
        # and kill the wrapped-around boundary lanes with the hoisted masks.
        y = (z1 + bias
             + pltpu.roll(z0, 1, axis=1) * ml
             + pltpu.roll(z2, chunk - 1, axis=1) * mr)
        return jnp.where(y > 0, y, alpha * y)       # PReLU

    def body(c, carry):
        off = pl.multiple_of(c * chunk, 128)
        x0 = x_ref[:, pl.ds(off, chunk)]
        # tcns[0]: 8 -> 12(16), no residual.
        h = layer_fn(lambda kw: w0_ref[kw], b_ref[0], a_ref[0], x0)
        for layer in range(1, N_TCNS):
            h = layer_fn(lambda kw, l=layer: w_ref[l - 1, kw],
                         b_ref[layer], a_ref[layer], h) + h   # residual add
            # TODO(synk): F.dropout(p=0.1) omitted (inference-mode identity); PyTorch's
            # training RNG mask is not reproducible here.
        o_ref[:, pl.ds(off, chunk)] = h
        return carry

    jax.lax.fori_loop(0, n_chunks, body, 0)


def _pick_tiles(total_lanes, width):
    """Pick (chunk, tile) lane widths.

    chunk: in-kernel working width — multiple of lcm(width, 128), ~CHUNK_TARGET lanes.
    tile : per-grid-step DMA width — multiple of chunk, ~TARGET_TILE_LANES lanes, capped
           so the grid keeps >= 2 steps (v7x megacore) whenever the problem allows it.
    """
    base = width * (128 // math.gcd(width, 128))          # lcm(width, 128)
    chunk = base * max(1, CHUNK_TARGET // base)
    n_chunks_total = pl.cdiv(total_lanes, chunk)
    chunks_per_tile = max(1, TARGET_TILE_LANES // chunk)
    if n_chunks_total >= 2:
        chunks_per_tile = min(chunks_per_tile, max(1, n_chunks_total // 2))
    chunks_per_tile = min(chunks_per_tile, n_chunks_total)
    return chunk, chunk * chunks_per_tile


@jax.jit
def conv_decoder_forward(x_encoded, weights, biases, alphas):
    """x_encoded: [8, N, H, W] f32 (PyTorch forward transposes dims 0/1 to NCHW).
    Returns [N, 12, H, W] f32 (dropout treated as identity / eval mode)."""
    cin0, n, hdim, w = x_encoded.shape
    L = len(weights)
    cout = weights[0].shape[0]    # 12
    cpad = C_PAD

    # Weights: per layer, three [co, ci] tap matrices (kw, co, ci); co padded 12 -> 16.
    w0 = weights[0].astype(jnp.float32)                    # [12, 8, 1, 3]
    w0_taps = jnp.stack([jnp.pad(w0[:, :, 0, kw], ((0, cpad - cout), (0, 0)))
                         for kw in range(3)])              # [3, cpad, cin0]
    w_rest = jnp.stack([
        jnp.stack([jnp.pad(wt.astype(jnp.float32)[:, :, 0, kw],
                           ((0, cpad - cout), (0, cpad - wt.shape[1])))
                   for kw in range(3)])
        for wt in weights[1:]])                            # [L-1, 3, cpad, cpad]
    b_all = jnp.stack([jnp.pad(jnp.asarray(b, jnp.float32), (0, cpad - b.shape[0]))
                       for b in biases])[:, :, None]       # [L, cpad, 1]
    a_all = jnp.stack([jnp.asarray(a, jnp.float32).reshape(()) for a in alphas])  # [L]

    # Activations: [cin0, N*H*W] — channels on sublanes, flat (N,H,W) on lanes.
    # No 8->16 channel-pad HBM pass; the kernel consumes 8 channels directly.
    total = n * hdim * w
    chunk, tile = _pick_tiles(total, w)
    total_pad = pl.cdiv(total, tile) * tile
    x2d = x_encoded.reshape(cin0, total).astype(jnp.float32)
    if total_pad != total:
        x2d = jnp.pad(x2d, ((0, 0), (0, total_pad - total)))

    flops = 2 * total * (3 * cpad * cin0 + (L - 1) * 3 * cpad * cpad)
    bytes_acc = (cin0 + cpad) * total * 4 + int(w0_taps.size + w_rest.size + b_all.size) * 4
    cost = pl.CostEstimate(flops=flops, transcendentals=0, bytes_accessed=bytes_acc)

    out2d = pl.pallas_call(
        partial(decoder_kernel, width=w, cpad=cpad, chunk=chunk),
        grid=(total_pad // tile,),
        out_shape=jax.ShapeDtypeStruct((cpad, total_pad), jnp.float32),
        in_specs=[
            pl.BlockSpec((cin0, tile), lambda i: (0, i)),                 # activations
            pl.BlockSpec((3, cpad, cin0), lambda i: (0, 0, 0)),           # layer-0 taps
            pl.BlockSpec((L - 1, 3, cpad, cpad), lambda i: (0, 0, 0, 0)),  # layers 1..5 taps
            pl.BlockSpec((L, cpad, 1), lambda i: (0, 0, 0)),              # biases
            pl.BlockSpec(memory_space=pltpu.MemorySpace.SMEM),            # PReLU slopes
        ],
        out_specs=pl.BlockSpec((cpad, tile), lambda i: (0, i)),
        compiler_params=pltpu.CompilerParams(
            dimension_semantics=("parallel",)),   # v7x megacore shards the lane-tile axis
        cost_estimate=cost,
    )(x2d, w0_taps, w_rest, b_all, a_all)

    out = out2d[:cout, :total].reshape(cout, n, hdim, w)
    # TODO(synk): the NCHW transpose is an extra HBM pass; a fused consumer could take
    # the [C, N, H, W] layout directly.
    return jnp.transpose(out, (1, 0, 2, 3))       # NCHW: [N, 12, H, W]


def ref_forward(x_encoded, weights, biases, alphas):
    """Pure-JAX reference mirroring the PyTorch forward (dropout = identity)."""
    x = jnp.transpose(x_encoded, (1, 0, 2, 3))    # NCHW

    def conv(xx, wt, bb):
        y = jax.lax.conv_general_dilated(
            xx, wt, window_strides=(1, 1), padding=((0, 0), (1, 1)),
            dimension_numbers=("NCHW", "OIHW", "NCHW"))
        return y + bb[None, :, None, None]

    def prelu(y, a):
        return jnp.where(y > 0, y, a * y)

    out = prelu(conv(x, weights[0], biases[0]), alphas[0])
    for layer in range(1, N_TCNS):
        out = prelu(conv(out, weights[layer], biases[layer]), alphas[layer]) + out
    return out


if __name__ == "__main__":
    key = jax.random.PRNGKey(0)
    N, H, W = 4, 32, 16
    CIN0, COUT = 8, 12

    keys = jax.random.split(key, 1 + 2 * N_TCNS)
    x_encoded = jax.random.normal(keys[0], (CIN0, N, H, W), jnp.float32)

    weights, biases, alphas = [], [], []
    for layer in range(N_TCNS):
        ci = CIN0 if layer == 0 else COUT
        kw_key, kb_key = keys[1 + 2 * layer], keys[2 + 2 * layer]
        weights.append(0.1 * jax.random.normal(kw_key, (COUT, ci, 1, 3), jnp.float32))
        biases.append(0.1 * jax.random.normal(kb_key, (COUT,), jnp.float32))
        alphas.append(jnp.float32(0.25))  # nn.PReLU() default init

    out = jax.block_until_ready(conv_decoder_forward(x_encoded, weights, biases, alphas))
    ref = ref_forward(x_encoded, weights, biases, alphas)

    assert out.shape == (N, COUT, H, W)
    np.testing.assert_allclose(np.asarray(out), np.asarray(ref), rtol=1e-4, atol=1e-4)
    print("KERNEL_OK")
</pallas_src>

<mosaic_0001>
module attributes {stable_mosaic.version = 11 : i64} {
  func.func @decoder_kernel(%arg0: i32, %arg1: memref<8x1024xf32, #tpu.memory_space<vmem>>, %arg2: memref<3x16x8xf32, #tpu.memory_space<vmem>>, %arg3: memref<5x3x16x16xf32, #tpu.memory_space<vmem>>, %arg4: memref<6x16x1xf32, #tpu.memory_space<vmem>>, %arg5: memref<6xf32, #tpu.memory_space<smem>>, %arg6: memref<16x1024xf32, #tpu.memory_space<vmem>>) attributes {dimension_semantics = [#tpu.dimension_semantics<parallel>], iteration_bounds = array<i64: 2>, scalar_prefetch = 0 : i64, scratch_operands = 0 : i64, tpu.core_type = #tpu.core_type<tc>, window_params = [{transform_indices = @transform_0, window_bounds = array<i64: 8, 1024>}, {pipeline_mode = #tpu.pipeline_mode<synchronous>, transform_indices = @transform_1, window_bounds = array<i64: 3, 16, 8>}, {pipeline_mode = #tpu.pipeline_mode<synchronous>, transform_indices = @transform_2, window_bounds = array<i64: 5, 3, 16, 16>}, {pipeline_mode = #tpu.pipeline_mode<synchronous>, transform_indices = @transform_3, window_bounds = array<i64: 6, 16, 1>}, {transform_indices = @transform_4, window_bounds = array<i64: 6>}, {transform_indices = @transform_5, window_bounds = array<i64: 16, 1024>}]} {
    %0 = tpu.iota {dimensions = array<i32: 1>} : vector<16x512xi32>
    %c16_i32 = arith.constant 16 : i32
    %c0_i32 = arith.constant 0 : i32
    %1 = arith.cmpi eq, %c16_i32, %c0_i32 : i32
    %c1_i32 = arith.constant 1 : i32
    %2 = arith.select %1, %c1_i32, %c16_i32 : i32
    %3 = vector.broadcast %2 : i32 to vector<16x512xi32>
    %4 = arith.remsi %0, %3 : vector<16x512xi32>
    %c0_i32_0 = arith.constant 0 : i32
    %5 = vector.broadcast %c0_i32_0 : i32 to vector<16x512xi32>
    %6 = arith.cmpi ne, %4, %5 : vector<16x512xi32>
    %c0_i32_1 = arith.constant 0 : i32
    %7 = vector.broadcast %c0_i32_1 : i32 to vector<16x512xi32>
    %8 = arith.cmpi slt, %4, %7 : vector<16x512xi32>
    %c0_i32_2 = arith.constant 0 : i32
    %9 = arith.cmpi slt, %2, %c0_i32_2 : i32
    %10 = vector.broadcast %9 : i1 to vector<16x512xi1>
    %11 = vector.broadcast %10 : vector<16x512xi1> to vector<16x512xi1>
    %12 = arith.xori %8, %11 : vector<16x512xi1>
    %13 = arith.andi %12, %6 : vector<16x512xi1>
    %14 = vector.broadcast %2 : i32 to vector<16x512xi32>
    %15 = arith.addi %4, %14 : vector<16x512xi32>
    %16 = arith.select %13, %15, %4 : vector<16x512xi1>, vector<16x512xi32>
    %c0_i32_3 = arith.constant 0 : i32
    %17 = vector.broadcast %c0_i32_3 : i32 to vector<16x512xi32>
    %18 = arith.cmpi ne, %16, %17 : vector<16x512xi32>
    %19 = arith.extui %18 : vector<16x512xi1> to vector<16x512xi32>
    %20 = arith.sitofp %19 : vector<16x512xi32> to vector<16x512xf32>
    %c15_i32 = arith.constant 15 : i32
    %21 = vector.broadcast %c15_i32 : i32 to vector<16x512xi32>
    %22 = arith.cmpi ne, %16, %21 : vector<16x512xi32>
    %23 = arith.extui %22 : vector<16x512xi1> to vector<16x512xi32>
    %24 = arith.sitofp %23 : vector<16x512xi32> to vector<16x512xf32>
    %c0_i32_4 = arith.constant 0 : i32
    %c2_i32 = arith.constant 2 : i32
    %25 = arith.addi %c0_i32_4, %c2_i32 : i32
    %c1_i32_5 = arith.constant 1 : i32
    scf.for %arg7 = %c0_i32_4 to %25 step %c1_i32_5  : i32 {
      %c512_i32 = arith.constant 512 : i32
      %26 = arith.muli %arg7, %c512_i32 : i32
      %27 = tpu.assume_multiple %26, 128 : i32
      %c0 = arith.constant 0 : index
      %28 = arith.index_cast %27 : i32 to index
      %29 = vector.load %arg1[%c0, %28] : memref<8x1024xf32, #tpu.memory_space<vmem>>, vector<8x512xf32>
      %c0_7 = arith.constant 0 : index
      %c0_8 = arith.constant 0 : index
      %c0_9 = arith.constant 0 : index
      %30 = vector.load %arg4[%c0_7, %c0_8, %c0_9] : memref<6x16x1xf32, #tpu.memory_space<vmem>>, vector<1x16x1xf32>
      %31 = vector.shape_cast %30 : vector<1x16x1xf32> to vector<16x1xf32>
      %c0_10 = arith.constant 0 : index
      %32 = memref.load %arg5[%c0_10] : memref<6xf32, #tpu.memory_space<smem>>
      %c1 = arith.constant 1 : index
      %c0_11 = arith.constant 0 : index
      %c0_12 = arith.constant 0 : index
      %33 = vector.load %arg2[%c1, %c0_11, %c0_12] : memref<3x16x8xf32, #tpu.memory_space<vmem>>, vector<1x16x8xf32>
      %34 = vector.shape_cast %33 : vector<1x16x8xf32> to vector<16x8xf32>
      %cst = arith.constant dense<0.000000e+00> : vector<16x512xf32>
      %35 = tpu.matmul %34, %29, %cst {dimension_numbers = #tpu.dot_dimension_numbers<[1], [0], [0], [1], [0, 0, 1, 1], [], []>} : vector<16x8xf32>, vector<8x512xf32>, vector<16x512xf32> -> vector<16x512xf32>
      %c0_13 = arith.constant 0 : index
      %c0_14 = arith.constant 0 : index
      %c0_15 = arith.constant 0 : index
      %36 = vector.load %arg2[%c0_13, %c0_14, %c0_15] : memref<3x16x8xf32, #tpu.memory_space<vmem>>, vector<1x16x8xf32>
      %37 = vector.shape_cast %36 : vector<1x16x8xf32> to vector<16x8xf32>
      %cst_16 = arith.constant dense<0.000000e+00> : vector<16x512xf32>
      %38 = tpu.matmul %37, %29, %cst_16 {dimension_numbers = #tpu.dot_dimension_numbers<[1], [0], [0], [1], [0, 0, 1, 1], [], []>} : vector<16x8xf32>, vector<8x512xf32>, vector<16x512xf32> -> vector<16x512xf32>
      %c2 = arith.constant 2 : index
      %c0_17 = arith.constant 0 : index
      %c0_18 = arith.constant 0 : index
      %39 = vector.load %arg2[%c2, %c0_17, %c0_18] : memref<3x16x8xf32, #tpu.memory_space<vmem>>, vector<1x16x8xf32>
      %40 = vector.shape_cast %39 : vector<1x16x8xf32> to vector<16x8xf32>
      %cst_19 = arith.constant dense<0.000000e+00> : vector<16x512xf32>
      %41 = tpu.matmul %40, %29, %cst_19 {dimension_numbers = #tpu.dot_dimension_numbers<[1], [0], [0], [1], [0, 0, 1, 1], [], []>} : vector<16x8xf32>, vector<8x512xf32>, vector<16x512xf32> -> vector<16x512xf32>
      %42 = vector.broadcast %31 : vector<16x1xf32> to vector<16x512xf32>
      %43 = arith.addf %35, %42 : vector<16x512xf32>
      %c1_i32_20 = arith.constant 1 : i32
      %44 = tpu.dynamic_rotate %38 by %c1_i32_20 dim 1 : vector<16x512xf32>, i32 -> vector<16x512xf32>
      %45 = arith.mulf %44, %20 : vector<16x512xf32>
      %46 = arith.addf %43, %45 : vector<16x512xf32>
      %c511_i32 = arith.constant 511 : i32
      %47 = tpu.dynamic_rotate %41 by %c511_i32 dim 1 : vector<16x512xf32>, i32 -> vector<16x512xf32>
      %48 = arith.mulf %47, %24 : vector<16x512xf32>
      %49 = arith.addf %46, %48 : vector<16x512xf32>
      %cst_21 = arith.constant 0.000000e+00 : f32
      %50 = vector.broadcast %cst_21 : f32 to vector<16x512xf32>
      %51 = arith.cmpf ogt, %49, %50 : vector<16x512xf32>
      %52 = vector.broadcast %32 : f32 to vector<16x512xf32>
      %53 = arith.mulf %52, %49 : vector<16x512xf32>
      %54 = arith.select %51, %49, %53 : vector<16x512xi1>, vector<16x512xf32>
      %c1_22 = arith.constant 1 : index
      %c0_23 = arith.constant 0 : index
      %c0_24 = arith.constant 0 : index
      %55 = vector.load %arg4[%c1_22, %c0_23, %c0_24] : memref<6x16x1xf32, #tpu.memory_space<vmem>>, vector<1x16x1xf32>
      %56 = vector.shape_cast %55 : vector<1x16x1xf32> to vector<16x1xf32>
      %c1_25 = arith.constant 1 : index
      %57 = memref.load %arg5[%c1_25] : memref<6xf32, #tpu.memory_space<smem>>
      %c0_26 = arith.constant 0 : index
      %c1_27 = arith.constant 1 : index
      %c0_28 = arith.constant 0 : index
      %c0_29 = arith.constant 0 : index
      %58 = vector.load %arg3[%c0_26, %c1_27, %c0_28, %c0_29] : memref<5x3x16x16xf32, #tpu.memory_space<vmem>>, vector<1x1x16x16xf32>
      %59 = vector.shape_cast %58 : vector<1x1x16x16xf32> to vector<16x16xf32>
      %cst_30 = arith.constant dense<0.000000e+00> : vector<16x512xf32>
      %60 = tpu.matmul %59, %54, %cst_30 {dimension_numbers = #tpu.dot_dimension_numbers<[1], [0], [0], [1], [0, 0, 1, 1], [], []>} : vector<16x16xf32>, vector<16x512xf32>, vector<16x512xf32> -> vector<16x512xf32>
      %c0_31 = arith.constant 0 : index
      %c0_32 = arith.constant 0 : index
      %c0_33 = arith.constant 0 : index
      %c0_34 = arith.constant 0 : index
      %61 = vector.load %arg3[%c0_31, %c0_32, %c0_33, %c0_34] : memref<5x3x16x16xf32, #tpu.memory_space<vmem>>, vector<1x1x16x16xf32>
      %62 = vector.shape_cast %61 : vector<1x1x16x16xf32> to vector<16x16xf32>
      %cst_35 = arith.constant dense<0.000000e+00> : vector<16x512xf32>
      %63 = tpu.matmul %62, %54, %cst_35 {dimension_numbers = #tpu.dot_dimension_numbers<[1], [0], [0], [1], [0, 0, 1, 1], [], []>} : vector<16x16xf32>, vector<16x512xf32>, vector<16x512xf32> -> vector<16x512xf32>
      %c0_36 = arith.constant 0 : index
      %c2_37 = arith.constant 2 : index
      %c0_38 = arith.constant 0 : index
      %c0_39 = arith.constant 0 : index
      %64 = vector.load %arg3[%c0_36, %c2_37, %c0_38, %c0_39] : memref<5x3x16x16xf32, #tpu.memory_space<vmem>>, vector<1x1x16x16xf32>
      %65 = vector.shape_cast %64 : vector<1x1x16x16xf32> to vector<16x16xf32>
      %cst_40 = arith.constant dense<0.000000e+00> : vector<16x512xf32>
      %66 = tpu.matmul %65, %54, %cst_40 {dimension_numbers = #tpu.dot_dimension_numbers<[1], [0], [0], [1], [0, 0, 1, 1], [], []>} : vector<16x16xf32>, vector<16x512xf32>, vector<16x512xf32> -> vector<16x512xf32>
      %67 = vector.broadcast %56 : vector<16x1xf32> to vector<16x512xf32>
      %68 = arith.addf %60, %67 : vector<16x512xf32>
      %c1_i32_41 = arith.constant 1 : i32
      %69 = tpu.dynamic_rotate %63 by %c1_i32_41 dim 1 : vector<16x512xf32>, i32 -> vector<16x512xf32>
      %70 = arith.mulf %69, %20 : vector<16x512xf32>
      %71 = arith.addf %68, %70 : vector<16x512xf32>
      %c511_i32_42 = arith.constant 511 : i32
      %72 = tpu.dynamic_rotate %66 by %c511_i32_42 dim 1 : vector<16x512xf32>, i32 -> vector<16x512xf32>
      %73 = arith.mulf %72, %24 : vector<16x512xf32>
      %74 = arith.addf %71, %73 : vector<16x512xf32>
      %cst_43 = arith.constant 0.000000e+00 : f32
      %75 = vector.broadcast %cst_43 : f32 to vector<16x512xf32>
      %76 = arith.cmpf ogt, %74, %75 : vector<16x512xf32>
      %77 = vector.broadcast %57 : f32 to vector<16x512xf32>
      %78 = arith.mulf %77, %74 : vector<16x512xf32>
      %79 = arith.select %76, %74, %78 : vector<16x512xi1>, vector<16x512xf32>
      %80 = arith.addf %79, %54 : vector<16x512xf32>
      %c2_44 = arith.constant 2 : index
      %c0_45 = arith.constant 0 : index
      %c0_46 = arith.constant 0 : index
      %81 = vector.load %arg4[%c2_44, %c0_45, %c0_46] : memref<6x16x1xf32, #tpu.memory_space<vmem>>, vector<1x16x1xf32>
      %82 = vector.shape_cast %81 : vector<1x16x1xf32> to vector<16x1xf32>
      %c2_47 = arith.constant 2 : index
      %83 = memref.load %arg5[%c2_47] : memref<6xf32, #tpu.memory_space<smem>>
      %c1_48 = arith.constant 1 : index
      %c1_49 = arith.constant 1 : index
      %c0_50 = arith.constant 0 : index
      %c0_51 = arith.constant 0 : index
      %84 = vector.load %arg3[%c1_48, %c1_49, %c0_50, %c0_51] : memref<5x3x16x16xf32, #tpu.memory_space<vmem>>, vector<1x1x16x16xf32>
      %85 = vector.shape_cast %84 : vector<1x1x16x16xf32> to vector<16x16xf32>
      %cst_52 = arith.constant dense<0.000000e+00> : vector<16x512xf32>
      %86 = tpu.matmul %85, %80, %cst_52 {dimension_numbers = #tpu.dot_dimension_numbers<[1], [0], [0], [1], [0, 0, 1, 1], [], []>} : vector<16x16xf32>, vector<16x512xf32>, vector<16x512xf32> -> vector<16x512xf32>
      %c1_53 = arith.constant 1 : index
      %c0_54 = arith.constant 0 : index
      %c0_55 = arith.constant 0 : index
      %c0_56 = arith.constant 0 : index
      %87 = vector.load %arg3[%c1_53, %c0_54, %c0_55, %c0_56] : memref<5x3x16x16xf32, #tpu.memory_space<vmem>>, vector<1x1x16x16xf32>
      %88 = vector.shape_cast %87 : vector<1x1x16x16xf32> to vector<16x16xf32>
      %cst_57 = arith.constant dense<0.000000e+00> : vector<16x512xf32>
      %89 = tpu.matmul %88, %80, %cst_57 {dimension_numbers = #tpu.dot_dimension_numbers<[1], [0], [0], [1], [0, 0, 1, 1], [], []>} : vector<16x16xf32>, vector<16x512xf32>, vector<16x512xf32> -> vector<16x512xf32>
      %c1_58 = arith.constant 1 : index
      %c2_59 = arith.constant 2 : index
      %c0_60 = arith.constant 0 : index
      %c0_61 = arith.constant 0 : index
      %90 = vector.load %arg3[%c1_58, %c2_59, %c0_60, %c0_61] : memref<5x3x16x16xf32, #tpu.memory_space<vmem>>, vector<1x1x16x16xf32>
      %91 = vector.shape_cast %90 : vector<1x1x16x16xf32> to vector<16x16xf32>
      %cst_62 = arith.constant dense<0.000000e+00> : vector<16x512xf32>
      %92 = tpu.matmul %91, %80, %cst_62 {dimension_numbers = #tpu.dot_dimension_numbers<[1], [0], [0], [1], [0, 0, 1, 1], [], []>} : vector<16x16xf32>, vector<16x512xf32>, vector<16x512xf32> -> vector<16x512xf32>
      %93 = vector.broadcast %82 : vector<16x1xf32> to vector<16x512xf32>
      %94 = arith.addf %86, %93 : vector<16x512xf32>
      %c1_i32_63 = arith.constant 1 : i32
      %95 = tpu.dynamic_rotate %89 by %c1_i32_63 dim 1 : vector<16x512xf32>, i32 -> vector<16x512xf32>
      %96 = arith.mulf %95, %20 : vector<16x512xf32>
      %97 = arith.addf %94, %96 : vector<16x512xf32>
      %c511_i32_64 = arith.constant 511 : i32
      %98 = tpu.dynamic_rotate %92 by %c511_i32_64 dim 1 : vector<16x512xf32>, i32 -> vector<16x512xf32>
      %99 = arith.mulf %98, %24 : vector<16x512xf32>
      %100 = arith.addf %97, %99 : vector<16x512xf32>
      %cst_65 = arith.constant 0.000000e+00 : f32
      %101 = vector.broadcast %cst_65 : f32 to vector<16x512xf32>
      %102 = arith.cmpf ogt, %100, %101 : vector<16x512xf32>
      %103 = vector.broadcast %83 : f32 to vector<16x512xf32>
      %104 = arith.mulf %103, %100 : vector<16x512xf32>
      %105 = arith.select %102, %100, %104 : vector<16x512xi1>, vector<16x512xf32>
      %106 = arith.addf %105, %80 : vector<16x512xf32>
      %c3 = arith.constant 3 : index
      %c0_66 = arith.constant 0 : index
      %c0_67 = arith.constant 0 : index
      %107 = vector.load %arg4[%c3, %c0_66, %c0_67] : memref<6x16x1xf32, #tpu.memory_space<vmem>>, vector<1x16x1xf32>
      %108 = vector.shape_cast %107 : vector<1x16x1xf32> to vector<16x1xf32>
      %c3_68 = arith.constant 3 : index
      %109 = memref.load %arg5[%c3_68] : memref<6xf32, #tpu.memory_space<smem>>
      %c2_69 = arith.constant 2 : index
      %c1_70 = arith.constant 1 : index
      %c0_71 = arith.constant 0 : index
      %c0_72 = arith.constant 0 : index
      %110 = vector.load %arg3[%c2_69, %c1_70, %c0_71, %c0_72] : memref<5x3x16x16xf32, #tpu.memory_space<vmem>>, vector<1x1x16x16xf32>
      %111 = vector.shape_cast %110 : vector<1x1x16x16xf32> to vector<16x16xf32>
      %cst_73 = arith.constant dense<0.000000e+00> : vector<16x512xf32>
      %112 = tpu.matmul %111, %106, %cst_73 {dimension_numbers = #tpu.dot_dimension_numbers<[1], [0], [0], [1], [0, 0, 1, 1], [], []>} : vector<16x16xf32>, vector<16x512xf32>, vector<16x512xf32> -> vector<16x512xf32>
      %c2_74 = arith.constant 2 : index
      %c0_75 = arith.constant 0 : index
      %c0_76 = arith.constant 0 : index
      %c0_77 = arith.constant 0 : index
      %113 = vector.load %arg3[%c2_74, %c0_75, %c0_76, %c0_77] : memref<5x3x16x16xf32, #tpu.memory_space<vmem>>, vector<1x1x16x16xf32>
      %114 = vector.shape_cast %113 : vector<1x1x16x16xf32> to vector<16x16xf32>
      %cst_78 = arith.constant dense<0.000000e+00> : vector<16x512xf32>
      %115 = tpu.matmul %114, %106, %cst_78 {dimension_numbers = #tpu.dot_dimension_numbers<[1], [0], [0], [1], [0, 0, 1, 1], [], []>} : vector<16x16xf32>, vector<16x512xf32>, vector<16x512xf32> -> vector<16x512xf32>
      %c2_79 = arith.constant 2 : index
      %c2_80 = arith.constant 2 : index
      %c0_81 = arith.constant 0 : index
      %c0_82 = arith.constant 0 : index
      %116 = vector.load %arg3[%c2_79, %c2_80, %c0_81, %c0_82] : memref<5x3x16x16xf32, #tpu.memory_space<vmem>>, vector<1x1x16x16xf32>
      %117 = vector.shape_cast %116 : vector<1x1x16x16xf32> to vector<16x16xf32>
      %cst_83 = arith.constant dense<0.000000e+00> : vector<16x512xf32>
      %118 = tpu.matmul %117, %106, %cst_83 {dimension_numbers = #tpu.dot_dimension_numbers<[1], [0], [0], [1], [0, 0, 1, 1], [], []>} : vector<16x16xf32>, vector<16x512xf32>, vector<16x512xf32> -> vector<16x512xf32>
      %119 = vector.broadcast %108 : vector<16x1xf32> to vector<16x512xf32>
      %120 = arith.addf %112, %119 : vector<16x512xf32>
      %c1_i32_84 = arith.constant 1 : i32
      %121 = tpu.dynamic_rotate %115 by %c1_i32_84 dim 1 : vector<16x512xf32>, i32 -> vector<16x512xf32>
      %122 = arith.mulf %121, %20 : vector<16x512xf32>
      %123 = arith.addf %120, %122 : vector<16x512xf32>
      %c511_i32_85 = arith.constant 511 : i32
      %124 = tpu.dynamic_rotate %118 by %c511_i32_85 dim 1 : vector<16x512xf32>, i32 -> vector<16x512xf32>
      %125 = arith.mulf %124, %24 : vector<16x512xf32>
      %126 = arith.addf %123, %125 : vector<16x512xf32>
      %cst_86 = arith.constant 0.000000e+00 : f32
      %127 = vector.broadcast %cst_86 : f32 to vector<16x512xf32>
      %128 = arith.cmpf ogt, %126, %127 : vector<16x512xf32>
      %129 = vector.broadcast %109 : f32 to vector<16x512xf32>
      %130 = arith.mulf %129, %126 : vector<16x512xf32>
      %131 = arith.select %128, %126, %130 : vector<16x512xi1>, vector<16x512xf32>
      %132 = arith.addf %131, %106 : vector<16x512xf32>
      %c4 = arith.constant 4 : index
      %c0_87 = arith.constant 0 : index
      %c0_88 = arith.constant 0 : index
      %133 = vector.load %arg4[%c4, %c0_87, %c0_88] : memref<6x16x1xf32, #tpu.memory_space<vmem>>, vector<1x16x1xf32>
      %134 = vector.shape_cast %133 : vector<1x16x1xf32> to vector<16x1xf32>
      %c4_89 = arith.constant 4 : index
      %135 = memref.load %arg5[%c4_89] : memref<6xf32, #tpu.memory_space<smem>>
      %c3_90 = arith.constant 3 : index
      %c1_91 = arith.constant 1 : index
      %c0_92 = arith.constant 0 : index
      %c0_93 = arith.constant 0 : index
      %136 = vector.load %arg3[%c3_90, %c1_91, %c0_92, %c0_93] : memref<5x3x16x16xf32, #tpu.memory_space<vmem>>, vector<1x1x16x16xf32>
      %137 = vector.shape_cast %136 : vector<1x1x16x16xf32> to vector<16x16xf32>
      %cst_94 = arith.constant dense<0.000000e+00> : vector<16x512xf32>
      %138 = tpu.matmul %137, %132, %cst_94 {dimension_numbers = #tpu.dot_dimension_numbers<[1], [0], [0], [1], [0, 0, 1, 1], [], []>} : vector<16x16xf32>, vector<16x512xf32>, vector<16x512xf32> -> vector<16x512xf32>
      %c3_95 = arith.constant 3 : index
      %c0_96 = arith.constant 0 : index
      %c0_97 = arith.constant 0 : index
      %c0_98 = arith.constant 0 : index
      %139 = vector.load %arg3[%c3_95, %c0_96, %c0_97, %c0_98] : memref<5x3x16x16xf32, #tpu.memory_space<vmem>>, vector<1x1x16x16xf32>
      %140 = vector.shape_cast %139 : vector<1x1x16x16xf32> to vector<16x16xf32>
      %cst_99 = arith.constant dense<0.000000e+00> : vector<16x512xf32>
      %141 = tpu.matmul %140, %132, %cst_99 {dimension_numbers = #tpu.dot_dimension_numbers<[1], [0], [0], [1], [0, 0, 1, 1], [], []>} : vector<16x16xf32>, vector<16x512xf32>, vector<16x512xf32> -> vector<16x512xf32>
      %c3_100 = arith.constant 3 : index
      %c2_101 = arith.constant 2 : index
      %c0_102 = arith.constant 0 : index
      %c0_103 = arith.constant 0 : index
      %142 = vector.load %arg3[%c3_100, %c2_101, %c0_102, %c0_103] : memref<5x3x16x16xf32, #tpu.memory_space<vmem>>, vector<1x1x16x16xf32>
      %143 = vector.shape_cast %142 : vector<1x1x16x16xf32> to vector<16x16xf32>
      %cst_104 = arith.constant dense<0.000000e+00> : vector<16x512xf32>
      %144 = tpu.matmul %143, %132, %cst_104 {dimension_numbers = #tpu.dot_dimension_numbers<[1], [0], [0], [1], [0, 0, 1, 1], [], []>} : vector<16x16xf32>, vector<16x512xf32>, vector<16x512xf32> -> vector<16x512xf32>
      %145 = vector.broadcast %134 : vector<16x1xf32> to vector<16x512xf32>
      %146 = arith.addf %138, %145 : vector<16x512xf32>
      %c1_i32_105 = arith.constant 1 : i32
      %147 = tpu.dynamic_rotate %141 by %c1_i32_105 dim 1 : vector<16x512xf32>, i32 -> vector<16x512xf32>
      %148 = arith.mulf %147, %20 : vector<16x512xf32>
      %149 = arith.addf %146, %148 : vector<16x512xf32>
      %c511_i32_106 = arith.constant 511 : i32
      %150 = tpu.dynamic_rotate %144 by %c511_i32_106 dim 1 : vector<16x512xf32>, i32 -> vector<16x512xf32>
      %151 = arith.mulf %150, %24 : vector<16x512xf32>
      %152 = arith.addf %149, %151 : vector<16x512xf32>
      %cst_107 = arith.constant 0.000000e+00 : f32
      %153 = vector.broadcast %cst_107 : f32 to vector<16x512xf32>
      %154 = arith.cmpf ogt, %152, %153 : vector<16x512xf32>
      %155 = vector.broadcast %135 : f32 to vector<16x512xf32>
      %156 = arith.mulf %155, %152 : vector<16x512xf32>
      %157 = arith.select %154, %152, %156 : vector<16x512xi1>, vector<16x512xf32>
      %158 = arith.addf %157, %132 : vector<16x512xf32>
      %c5 = arith.constant 5 : index
      %c0_108 = arith.constant 0 : index
      %c0_109 = arith.constant 0 : index
      %159 = vector.load %arg4[%c5, %c0_108, %c0_109] : memref<6x16x1xf32, #tpu.memory_space<vmem>>, vector<1x16x1xf32>
      %160 = vector.shape_cast %159 : vector<1x16x1xf32> to vector<16x1xf32>
      %c5_110 = arith.constant 5 : index
      %161 = memref.load %arg5[%c5_110] : memref<6xf32, #tpu.memory_space<smem>>
      %c4_111 = arith.constant 4 : index
      %c1_112 = arith.constant 1 : index
      %c0_113 = arith.constant 0 : index
      %c0_114 = arith.constant 0 : index
      %162 = vector.load %arg3[%c4_111, %c1_112, %c0_113, %c0_114] : memref<5x3x16x16xf32, #tpu.memory_space<vmem>>, vector<1x1x16x16xf32>
      %163 = vector.shape_cast %162 : vector<1x1x16x16xf32> to vector<16x16xf32>
      %cst_115 = arith.constant dense<0.000000e+00> : vector<16x512xf32>
      %164 = tpu.matmul %163, %158, %cst_115 {dimension_numbers = #tpu.dot_dimension_numbers<[1], [0], [0], [1], [0, 0, 1, 1], [], []>} : vector<16x16xf32>, vector<16x512xf32>, vector<16x512xf32> -> vector<16x512xf32>
      %c4_116 = arith.constant 4 : index
      %c0_117 = arith.constant 0 : index
      %c0_118 = arith.constant 0 : index
      %c0_119 = arith.constant 0 : index
      %165 = vector.load %arg3[%c4_116, %c0_117, %c0_118, %c0_119] : memref<5x3x16x16xf32, #tpu.memory_space<vmem>>, vector<1x1x16x16xf32>
      %166 = vector.shape_cast %165 : vector<1x1x16x16xf32> to vector<16x16xf32>
      %cst_120 = arith.constant dense<0.000000e+00> : vector<16x512xf32>
      %167 = tpu.matmul %166, %158, %cst_120 {dimension_numbers = #tpu.dot_dimension_numbers<[1], [0], [0], [1], [0, 0, 1, 1], [], []>} : vector<16x16xf32>, vector<16x512xf32>, vector<16x512xf32> -> vector<16x512xf32>
      %c4_121 = arith.constant 4 : index
      %c2_122 = arith.constant 2 : index
      %c0_123 = arith.constant 0 : index
      %c0_124 = arith.constant 0 : index
      %168 = vector.load %arg3[%c4_121, %c2_122, %c0_123, %c0_124] : memref<5x3x16x16xf32, #tpu.memory_space<vmem>>, vector<1x1x16x16xf32>
      %169 = vector.shape_cast %168 : vector<1x1x16x16xf32> to vector<16x16xf32>
      %cst_125 = arith.constant dense<0.000000e+00> : vector<16x512xf32>
      %170 = tpu.matmul %169, %158, %cst_125 {dimension_numbers = #tpu.dot_dimension_numbers<[1], [0], [0], [1], [0, 0, 1, 1], [], []>} : vector<16x16xf32>, vector<16x512xf32>, vector<16x512xf32> -> vector<16x512xf32>
      %171 = vector.broadcast %160 : vector<16x1xf32> to vector<16x512xf32>
      %172 = arith.addf %164, %171 : vector<16x512xf32>
      %c1_i32_126 = arith.constant 1 : i32
      %173 = tpu.dynamic_rotate %167 by %c1_i32_126 dim 1 : vector<16x512xf32>, i32 -> vector<16x512xf32>
      %174 = arith.mulf %173, %20 : vector<16x512xf32>
      %175 = arith.addf %172, %174 : vector<16x512xf32>
      %c511_i32_127 = arith.constant 511 : i32
      %176 = tpu.dynamic_rotate %170 by %c511_i32_127 dim 1 : vector<16x512xf32>, i32 -> vector<16x512xf32>
      %177 = arith.mulf %176, %24 : vector<16x512xf32>
      %178 = arith.addf %175, %177 : vector<16x512xf32>
      %cst_128 = arith.constant 0.000000e+00 : f32
      %179 = vector.broadcast %cst_128 : f32 to vector<16x512xf32>
      %180 = arith.cmpf ogt, %178, %179 : vector<16x512xf32>
      %181 = vector.broadcast %161 : f32 to vector<16x512xf32>
      %182 = arith.mulf %181, %178 : vector<16x512xf32>
      %183 = arith.select %180, %178, %182 : vector<16x512xi1>, vector<16x512xf32>
      %184 = arith.addf %183, %158 : vector<16x512xf32>
      %c0_129 = arith.constant 0 : index
      %185 = arith.index_cast %27 : i32 to index
      %186 = vector.load %arg6[%c0_129, %185] : memref<16x1024xf32, #tpu.memory_space<vmem>>, vector<16x512xf32>
      tpu.vector_store %arg6[%c0_129, %185], %184 {strides = array<i32>} : memref<16x1024xf32, #tpu.memory_space<vmem>>, vector<16x512xf32>,
    }
    %c2_i32_6 = arith.constant 2 : i32
    return
  }
  func.func @transform_0(%arg0: i32) -> (i32, i32) {
    %c0_i32 = arith.constant 0 : i32
    %c0_i32_0 = arith.constant 0 : i32
    return %c0_i32, %arg0 : i32, i32
  }
  func.func @transform_1(%arg0: i32) -> (i32, i32, i32) {
    %c0_i32 = arith.constant 0 : i32
    %c0_i32_0 = arith.constant 0 : i32
    %c0_i32_1 = arith.constant 0 : i32
    %c0_i32_2 = arith.constant 0 : i32
    return %c0_i32, %c0_i32_0, %c0_i32_1 : i32, i32, i32
  }
  func.func @transform_2(%arg0: i32) -> (i32, i32, i32, i32) {
    %c0_i32 = arith.constant 0 : i32
    %c0_i32_0 = arith.constant 0 : i32
    %c0_i32_1 = arith.constant 0 : i32
    %c0_i32_2 = arith.constant 0 : i32
    %c0_i32_3 = arith.constant 0 : i32
    return %c0_i32, %c0_i32_0, %c0_i32_1, %c0_i32_2 : i32, i32, i32, i32
  }
  func.func @transform_3(%arg0: i32) -> (i32, i32, i32) {
    %c0_i32 = arith.constant 0 : i32
    %c0_i32_0 = arith.constant 0 : i32
    %c0_i32_1 = arith.constant 0 : i32
    %c0_i32_2 = arith.constant 0 : i32
    return %c0_i32, %c0_i32_0, %c0_i32_1 : i32, i32, i32
  }
  func.func @transform_4(%arg0: i32) -> i32 {
    %c0_i32 = arith.constant 0 : i32
    %c0_i32_0 = arith.constant 0 : i32
    return %c0_i32 : i32
  }
  func.func @transform_5(%arg0: i32) -> (i32, i32) {
    %c0_i32 = arith.constant 0 : i32
    %c0_i32_0 = arith.constant 0 : i32
    return %c0_i32, %arg0 : i32, i32
  }
}

</mosaic_0001>

<bundles_post_ra>
// kernel: conv_decoder_forward.1
= control target key start
LH: loop header
LB: loop body
LE: loop exit
PB: predicated region body
PF: predicated region fallthrough
CT: control target
= control target key end

     0   :  { %10 = vsyncpa [#allocation3], 0  ;;  %s4558_s18 = smov 0   ;;  %s4560_s19 = smov 0   ;;  %s5642_s0 = inlined_call_operand.vmem [shape: f32[8,2048], index: 0, kind: input, shape index: {}]   ;;  %s5643_s1 = inlined_call_operand.vmem [shape: f32[3,16,8], index: 1, kind: input, shape index: {}]   ;;  %s5644_s2 = inlined_call_operand.vmem [shape: f32[5,3,16,16], index: 2, kind: input, shape index: {}]   ;;  %s5645_s3 = inlined_call_operand.vmem [shape: f32[6,16,1], index: 3, kind: input, shape index: {}]   ;;  %s5646_s4 = inlined_call_operand.vmem [shape: f32[6], index: 4, kind: input, shape index: {}]   ;;  %s5647_s5 = inlined_call_operand.vmem [shape: f32[16,2048], index: 5, kind: output, shape index: {}]  }
   0x1   :  { %s4562_s20 = smov 0  }
   0x2 LB: > { %s4571_s21 = sadd.s32 4294967295, %s4516_s20   ;;  %s4573_s22 = sadd.s32 1, %s4516_s20   ;;  %s4516_s20 = sphi %s4562_s20, %s5652_s20   ;;  %s4512_s19 = sphi %s4560_s19, %s5651_s19   ;;  %s4508_s18 = sphi %s4558_s18, %s5650_s18  }
   0x3   : > { %s130_s23 = ssub.s32 %s4516_s20, %s4573_s22  ;;  %s133_s24 = sadd.s32 1, %s4512_s19 }
   0x4   : > { %p131_p0 = scmp.eq.s32.totalorder %s130_s23, 0  ;;  %p143_p1 = scmp.ne.s32.totalorder %s4512_s19, %s4508_s18 }
   0x5   : > { %p144_p2 = scmp.eq.s32.totalorder %s4571_s21, 1  ;;  %p4157_p3 = scmp.ge.s32.totalorder %s4516_s20, 1 }
   0x6   : > { %s4581_s25 = scalar_select %p131_p0, %s4512_s19, %s133_s24  }
   0x7   : > { %p4583_p4 = por %p144_p2, %p143_p1  ;;  %p157_p5 = scmp.lt.s32.totalorder %s4516_s20, 3 }
   0x8   : > { %p4429_p6 = scmp.eq.s32.totalorder %s4571_s21, 0  ;;  %s179_s30 = sshll.u32 %s5646_s4, 4  ;;  %s180_s30 = int_to_ptr.vmem [resolvable:$true] %s179_s30 }
   0x9   : > { %p4588_p7 = pnand %p4157_p3, %p157_p5  ;;  %s4471_s6 = scalar_lea.vmem %s180_s30, 16 }
   0xa   : > { %p4472_p10 = scmp.ne.s32.totalorder %s180_s30, %s4471_s6  ;;  %p4479_p0 = scmp.lt.s32.totalorder %s180_s30, %s180_s30 }
   0xb   : > { %p4425_p8 = pneg %p4588_p7  ;;  %p4480_p1 = scmp.lt.s32.totalorder %s4471_s6, %s4471_s6 }
   0xd   : > { %p4426_p9 = pnand %p4429_p6, %p4425_p8  ;;  %p4481_p2 = por %p4480_p1, %p4479_p0 }
   0xf   : > { %p4473_p11 = pneg %p4426_p9 }
  0x11   : > { %p4474_p12 = pnand %p4473_p11, %p4472_p10 }
  0x13   : > { %p4475_p13 = pneg %p4474_p12 }
  0x15   : > { %p4482_p3 = pnand %p4481_p2, %p4475_p13 }
  0x17   : > { %4485 = shalt.err (!%p4482_p3)
}
  0x18   : > { %s4522_s7 = smov [#allocation2]   ;;  %201 = sbr.rel (%p4588_p7) target bundleno = 2304 (0x900), region = 40 }
  0x19   : > { %4428 = dma.vmem_to_smem (!%p4426_p9), %s180_s30, 16, %s4522_s7, [#allocation3]  }
  0x1f   : > { %4503 = dma.done.wait (%p4429_p6), [#allocation3], 16  }
  0x20   : > { %4505 = vsyncadd (%p4429_p6), [#allocation3], 4294967280 }
  0x21   : > { %207 = sfence }
  0x22   : > { %s226_s8 = sand.u32 1, %s4508_s18   ;;  %s4163_s9 = sshll.u32 %s4571_s21, 3  ;;  %v236_v0 = vlaneseq  ;;  %v4523_v9 = vmov 0.0  }
  0x23   : > { %s4162_s10 = sshll.u32 %s226_s8, 7  ;;  %p230_p5 = scmp.lt.s32.totalorder %s4163_s9, 15 }
  0x24   : > { %v4607_v1 = vand.u32 127, %v236_v0  ;;  %s4634_s15 = scalar_lea.vmem [#allocation4], %s4162_s10  ;;  %s4636_s16 = smov 0  }
  0x25   : > { %s5654_s9 = smov (!%p230_p5, %s4163_s9), 15 }
  0x26   : > { %v238_v2 = vadd.s32 128, %v4607_v1  ;;  %v239_v3 = vadd.s32 256, %v4607_v1  ;;  %v240_v4 = vadd.s32 384, %v4607_v1  ;;  %v245_v5 = vand.u32 15, %v4607_v1  ;;  %s4164_s11 = sshll.u32 %s5654_s9, 3 }
  0x27   : > { %s4616_s14 = scalar_lea.vmem %s5642_s0, %s4164_s11 }
  0x28   : > { %v252_v6 = vand.u32 15, %v238_v2  ;;  %v259_v7 = vand.u32 15, %v239_v3  ;;  %v266_v8 = vand.u32 15, %v240_v4  ;;  %vm289_vm0 = vcmp.ne.s32.totalorder %v245_v5, 0 }
  0x29   : > { %v4618_v10 = vsel %vm289_vm0, 1.0, %v4523_v9  ;;  %vm301_vm1 = vcmp.ne.s32.totalorder %v245_v5, 15 }
  0x2a   : > { %vm290_vm2 = vcmp.ne.s32.totalorder %v252_v6, 0  ;;  %vm291_vm3 = vcmp.ne.s32.totalorder %v259_v7, 0  ;;  %vm292_vm4 = vcmp.ne.s32.totalorder %v266_v8, 0  ;;  %vm302_vm5 = vcmp.ne.s32.totalorder %v252_v6, 15 }
  0x2b   : > { %v4620_v11 = vsel %vm290_vm2, 1.0, %v4523_v9  ;;  %v4622_v12 = vsel %vm291_vm3, 1.0, %v4523_v9  ;;  %v4624_v13 = vsel %vm292_vm4, 1.0, %v4523_v9  ;;  %vm303_vm6 = vcmp.ne.s32.totalorder %v259_v7, 15 }
  0x2c   : > { %vm304_vm7 = vcmp.ne.s32.totalorder %v266_v8, 15  ;;  %v4626_v14 = vsel %vm301_vm1, 1.0, %v4523_v9  ;;  %v4628_v15 = vsel %vm302_vm5, 1.0, %v4523_v9  ;;  %v4630_v16 = vsel %vm303_vm6, 1.0, %v4523_v9 }
  0x2d   : > { %v4632_v17 = vsel %vm304_vm7, 1.0, %v4523_v9 }
  0x2e LB: >> { %v4524_v18 = vmov 0.0   ;;  %s4173_s17 = sshll.u32 %s4520_s16, 9  ;;  %v4525_v19 = vmov 0   ;;  %v328_v20 = vld [vmem:[%s5645_s3] sm:$0xff]  ;;  %vm336_vm8 = vcmask 64512   ;;  %v335_v26 = vld [vmem:[%s5643_s1 + $0x8] sm:$0xff]  ;;  %s4520_s16 = sphi %s4636_s16, %s318_s16  }
  0x2f   : >> { %407 = vmatprep.mubr.f32.mxu0 %v4524_v18  ;;  %484 = vmatprep.mubr.f32.mxu1 %v4524_v18  ;;  %s4647_s23 = sshra.s32 %s4173_s17, 7  ;;  %v334_v21 = vld [vmem:[%s5643_s1] sm:$0xff]  ;;  %v329_v27 = vld [vmem:[%s5645_s3 + $0x8] sm:$0xff]  ;;  %v4175_v30 = vld [vmem:[%s5643_s1 + $0x10] sm:$0xff]  ;;  %s4527_s28 = smov 127   ;;  %vm846_vm9 = vcmp.lt.s32.totalorder %v4607_v1, 1 }
  0x30   : >> { %4469 = vset.pattern.permute.xlu0 %v4525_v19  ;;  %4470 = vset.pattern.permute.xlu1 %v4525_v19  ;;  %s4174_s24 = sshll.u32 %s4647_s23, 3  ;;  %v4181_v28 = vld [vmem:[%s5643_s1 + $0x20] sm:$0xff]  ;;  %v4182_v29 = vld [vmem:[%s5643_s1 + $0x28] sm:$0xff]  ;;  %v4176_v31 = vld [vmem:[%s5643_s1 + $0x18] sm:$0xff]  ;;  %s330_s8 = sld [smem:[#allocation2]]  ;;  %vm887_vm10 = vcmp.lt.s32.totalorder %v4607_v1, 127 }
  0x31   : >> { %662 = vperm.xlu0 %4469, %v328_v20   ;;  %s323_s27 = scalar_lea.vmem %s4616_s14, %s4174_s24  ;;  %v4191_v56 = vld [vmem:[%s5645_s3 + $0x10] sm:$0xff]  ;;  %v4192_v57 = vld [vmem:[%s5645_s3 + $0x18] sm:$0xff]  ;;  %vm946_vm3 = vcmask 130048   ;;  %s4193_s12 = sld [smem:[#allocation2 + $0x1]] }
  0x32   : >> { %v325_v22 = vld [vmem:[%s323_s27 + $0x8] sm:$0xff]  ;;  %v327_v23 = vld [vmem:[%s323_s27 + $0x18] sm:$0xff]  ;;  %v324_v24 = vld [vmem:[%s323_s27] sm:$0xff]  ;;  %s4212_s20 = sld [smem:[#allocation2 + $0x2]]  ;;  %s4233_s7 = sld [smem:[#allocation2 + $0x3]] }
  0x33   : >> { %343 = vmatprep.subr.mxu0 %v325_v22  ;;  %420 = vmatprep.subr.mxu1 %v327_v23  ;;  %v326_v25 = vld [vmem:[%s323_s27 + $0x10] sm:$0xff]  ;;  %s4526_s27 = smov 1   ;;  %s4254_s11 = sld [smem:[#allocation2 + $0x4]] }
  0x34   : >> { %344 = vmatpush1.msra.mxu0 %v324_v24  ;;  %421 = vmatpush1.msra.mxu1 %v326_v25  ;;  %s318_s16 = sadd.s32 1, %s4520_s16  }
  0x35   : >> { %4177 = vmatmul.mubr.msk.f32.vlgmr.msra.gmra.mrb[0].mxu0 %vm336_vm8, %v334_v21  ;;  %4179 = vmatmul.mubr.msk.f32.vlgmr.msra.gmra.mrb[0].mxu1 %vm336_vm8, %v334_v21  ;;  %p315_p6 = scmp.ge.s32.totalorder %s318_s16, 2  }
  0x36   : >> { %413 = vmatprep.mubr.f32.mxu0 %v4524_v18  ;;  %490 = vmatprep.mubr.f32.mxu1 %v4524_v18  ;;  %v4731_v21 = vstv %s330_s8 }
  0x37   : >> { %506 = vmatprep.subr.mxu0 %v325_v22  ;;  %583 = vmatprep.subr.mxu1 %v327_v23 }
  0x38   : >> { %507 = vmatpush1.msra.mxu0 %v324_v24  ;;  %584 = vmatpush1.msra.mxu1 %v326_v25 }
  0x39   : >> { %4178 = vmatmul.mubr.msk.f32.gmra.mrb[2].mxu0 %vm336_vm8, %v335_v26  ;;  %4180 = vmatmul.mubr.msk.f32.gmra.mrb[2].mxu1 %vm336_vm8, %v335_v26 }
  0x3a   : >> { %570 = vmatprep.mubr.f32.mxu0 %v4524_v18  ;;  %647 = vmatprep.mubr.f32.mxu1 %v4524_v18 }
  0x3b   : >> { %676 = vmatprep.subr.mxu0 %v325_v22  ;;  %753 = vmatprep.subr.mxu1 %v327_v23 }
  0x3c   : >> { %667 = vperm.xlu0 %4469, %v329_v27  }
  0x3d   : >> { %4183 = vmatmul.mubr.msk.f32.vlgmr.msra.gmra.mrb[4].mxu0 %vm336_vm8, %v4181_v28  ;;  %4185 = vmatmul.mubr.msk.f32.vlgmr.msra.gmra.mrb[4].mxu1 %vm336_vm8, %v4181_v28 }
  0x3e   : >> { %576 = vmatprep.mubr.f32.mxu0 %v4524_v18  ;;  %653 = vmatprep.mubr.f32.mxu1 %v4524_v18 }
  0x3f   : >> { %677 = vmatpush1.msra.mxu0 %v324_v24  ;;  %754 = vmatpush1.msra.mxu1 %v326_v25 }
  0x41   : >> { %4184 = vmatmul.mubr.msk.f32.gmra.mrb[6].mxu0 %vm336_vm8, %v4182_v29  ;;  %4186 = vmatmul.mubr.msk.f32.gmra.mrb[6].mxu1 %vm336_vm8, %v4182_v29 }
  0x42   : >> { %740 = vmatprep.mubr.f32.mxu0 %v4524_v18  ;;  %817 = vmatprep.mubr.f32.mxu1 %v4524_v18 }
  0x45   : >> { %4187 = vmatmul.mubr.msk.f32.vlgmr.msra.gmra.mrb[8].mxu0 %vm336_vm8, %v4175_v30  ;;  %4189 = vmatmul.mubr.msk.f32.vlgmr.msra.gmra.mrb[8].mxu1 %vm336_vm8, %v4175_v30 }
  0x46   : >> { %746 = vmatprep.mubr.f32.mxu0 %v4524_v18  ;;  %823 = vmatprep.mubr.f32.mxu1 %v4524_v18 }
  0x49   : >> { %4188 = vmatmul.mubr.msk.f32.gmra.mrb[10].mxu0 %vm336_vm8, %v4176_v31  ;;  %4190 = vmatmul.mubr.msk.f32.gmra.mrb[10].mxu1 %vm336_vm8, %v4176_v31 }
  0x4a   : >> { %1017 = vmatprep.mubr.f32.mxu0 %v4524_v18  ;;  %1094 = vmatprep.mubr.f32.mxu1 %v4524_v18 }
  0xb0   : >> { %v663_v58 = vpop.permute.xlu0 %662 }
  0xbb   : >> { %v668_v59 = vpop.permute.xlu0 %667 }
 0x108   : >> { %v409_v32 = vpop.f32.mrb[0].mxu0  ;;  %v486_v33 = vpop.f32.mrb[0].mxu1 }
 0x109   : >> { %838 = vrot.lane.b32.xlu0 %v486_v33, %s4526_s27  ;;  %830 = vrot.lane.b32.xlu1 %v409_v32, %s4526_s27  ;;  %v411_v34 = vpop.f32.mrb[1].mxu0  ;;  %v488_v35 = vpop.f32.mrb[1].mxu1 }
 0x10c   : >> { %v415_v36 = vpop.f32.mrb[2].mxu0  ;;  %v492_v37 = vpop.f32.mrb[2].mxu1 }
 0x10d   : >> { %834 = vrot.lane.b32.xlu0 %v411_v34, %s4526_s27  ;;  %832 = vrot.lane.b32.xlu1 %v415_v36, %s4526_s27  ;;  %v417_v38 = vpop.f32.mrb[3].mxu0  ;;  %v494_v39 = vpop.f32.mrb[3].mxu1 }
 0x110   : >> { %v572_v40 = vpop.f32.mrb[4].mxu0  ;;  %v649_v41 = vpop.f32.mrb[4].mxu1 }
 0x111   : >> { %842 = vrot.lane.b32.xlu0 %v488_v35, %s4526_s27  ;;  %840 = vrot.lane.b32.xlu1 %v492_v37, %s4526_s27  ;;  %v574_v42 = vpop.f32.mrb[5].mxu0  ;;  %v651_v43 = vpop.f32.mrb[5].mxu1 }
 0x114   : >> { %v578_v44 = vpop.f32.mrb[6].mxu0  ;;  %v655_v45 = vpop.f32.mrb[6].mxu1 }
 0x115   : >> { %836 = vrot.lane.b32.xlu1 %v417_v38, %s4526_s27  ;;  %871 = vrot.lane.b32.xlu0 %v572_v40, %s4527_s28  ;;  %v580_v46 = vpop.f32.mrb[7].mxu0  ;;  %v657_v47 = vpop.f32.mrb[7].mxu1 }
 0x118   : >> { %v742_v48 = vpop.f32.mrb[8].mxu0  ;;  %v819_v49 = vpop.f32.mrb[8].mxu1 }
 0x119   : >> { %844 = vrot.lane.b32.xlu1 %v494_v39, %s4526_s27  ;;  %879 = vrot.lane.b32.xlu0 %v649_v41, %s4527_s28  ;;  %v744_v50 = vpop.f32.mrb[9].mxu0  ;;  %v821_v51 = vpop.f32.mrb[9].mxu1  ;;  %v743_v28 = vadd.f32 %v742_v48, %v663_v58  ;;  %v820_v29 = vadd.f32 %v819_v49, %v663_v58 }
 0x11a   : >> { %v745_v19 = vadd.f32 %v744_v50, %v663_v58  ;;  %v822_v30 = vadd.f32 %v821_v51, %v663_v58 }
 0x11c   : >> { %v748_v52 = vpop.f32.mrb[10].mxu0  ;;  %v825_v53 = vpop.f32.mrb[10].mxu1 }
 0x11d   : >> { %875 = vrot.lane.b32.xlu0 %v574_v42, %s4527_s28  ;;  %873 = vrot.lane.b32.xlu1 %v578_v44, %s4527_s28  ;;  %v4710_v54 = vpop.f32.mrb[11].mxu1  ;;  %v750_v55 = vpop.f32.mrb[11].mxu0  ;;  %v749_v32 = vadd.f32 %v748_v52, %v668_v59 }
 0x121   : >> { %883 = vrot.lane.b32.xlu0 %v651_v43, %s4527_s28  ;;  %881 = vrot.lane.b32.xlu1 %v655_v45, %s4527_s28 }
 0x125   : >> { %1272 = vperm.xlu0 %4469, %v4191_v56   ;;  %877 = vrot.lane.b32.xlu1 %v580_v46, %s4527_s28  ;;  %v826_v46 = vadd.f32 %v825_v53, %v668_v59 }
 0x129   : >> { %885 = vrot.lane.b32.xlu1 %v657_v47, %s4527_s28  ;;  %v751_v47 = vadd.f32 %v750_v55, %v668_v59 }
 0x12d   : >> { %1277 = vperm.xlu1 %4470, %v4192_v57   ;;  %v828_v57 = vadd.f32 %v4710_v54, %v668_v59 }
 0x17b   : >> { %v839_v60 = vpop.permute.xlu0 %838  ;;  %v831_v61 = vpop.permute.xlu1 %830 }
 0x17f   : >> { %v835_v62 = vpop.permute.xlu0 %834  ;;  %v833_v63 = vpop.permute.xlu1 %832 }
 0x180   : >> { %v851_v5 = vsel %vm846_vm9, %v831_v61, %v835_v62  ;;  %v849_v20 = vsel %vm846_vm9, %v835_v62, %v839_v60 }
 0x181   : >> { %v856_v9 = vmul.f32 %v4620_v11, %v851_v5  ;;  %v857_v36 = vmul.f32 %v4622_v12, %v849_v20 }
 0x183   : >> { %v843_v0 = vpop.permute.xlu0 %842  ;;  %v841_v2 = vpop.permute.xlu1 %840  ;;  %v864_v33 = vadd.f32 %v856_v9, %v745_v19  ;;  %v865_v58 = vadd.f32 %v857_v36, %v820_v29 }
 0x184   : >> { %v853_v8 = vsel %vm846_vm9, %v843_v0, %v831_v61  ;;  %v847_v37 = vsel %vm846_vm9, %v839_v60, %v843_v0 }
 0x185   : >> { %v855_v24 = vmul.f32 %v4618_v10, %v853_v8  ;;  %v858_v50 = vmul.f32 %v4624_v13, %v847_v37 }
 0x187   : >> { %v837_v3 = vpop.permute.xlu1 %836  ;;  %v872_v4 = vpop.permute.xlu0 %871  ;;  %v863_v42 = vadd.f32 %v855_v24, %v743_v28  ;;  %v866_v59 = vadd.f32 %v858_v50, %v822_v30  ;;  %v4195_v50 = vld [vmem:[%s5644_s2 + $0x18] sm:$0xff] }
 0x188   : >> { %v852_v25 = vsel %vm846_vm9, %v833_v63, %v837_v3  ;;  %v850_v38 = vsel %vm846_vm9, %v837_v3, %v841_v2 }
 0x189   : >> { %v860_v39 = vmul.f32 %v4620_v11, %v852_v25  ;;  %v861_v51 = vmul.f32 %v4622_v12, %v850_v38 }
 0x18b   : >> { %v845_v6 = vpop.permute.xlu1 %844  ;;  %v880_v7 = vpop.permute.xlu0 %879  ;;  %v868_v60 = vadd.f32 %v860_v39, %v751_v47  ;;  %v4200_v47 = vld [vmem:[%s5644_s2 + $0x20] sm:$0xff] }
 0x18c   : >> { %v854_v34 = vsel %vm846_vm9, %v845_v6, %v833_v63  ;;  %v848_v43 = vsel %vm846_vm9, %v841_v2, %v845_v6 }
 0x18d   : >> { %v859_v48 = vmul.f32 %v4618_v10, %v854_v34  ;;  %v862_v61 = vmul.f32 %v4624_v13, %v848_v43 }
 0x18f   : >> { %v876_v22 = vpop.permute.xlu0 %875  ;;  %v874_v23 = vpop.permute.xlu1 %873  ;;  %v867_v2 = vadd.f32 %v859_v48, %v749_v32  ;;  %v4201_v48 = vld [vmem:[%s5644_s2 + $0x28] sm:$0xff] }
 0x190   : >> { %v890_v26 = vsel %vm887_vm10, %v876_v22, %v880_v7  ;;  %v892_v27 = vsel %vm887_vm10, %v872_v4, %v876_v22 }
 0x191   : >> { %v897_v31 = vmul.f32 %v4628_v15, %v890_v26  ;;  %v896_v35 = vmul.f32 %v4626_v14, %v892_v27 }
 0x193   : >> { %v884_v40 = vpop.permute.xlu0 %883  ;;  %v882_v41 = vpop.permute.xlu1 %881  ;;  %v905_v44 = vadd.f32 %v897_v31, %v864_v33  ;;  %v904_v52 = vadd.f32 %v896_v35, %v863_v42 }
 0x194   : >> { %v888_v45 = vsel %vm887_vm10, %v880_v7, %v884_v40  ;;  %v894_v49 = vsel %vm887_vm10, %v884_v40, %v872_v4  ;;  %v869_v4 = vadd.f32 %v861_v51, %v826_v46  ;;  %v870_v7 = vadd.f32 %v862_v61, %v828_v57  ;;  %v944_v40 = vld [vmem:[%s5644_s2] sm:$0xff]  ;;  %v945_v46 = vld [vmem:[%s5644_s2 + $0x8] sm:$0xff] }
 0x195   : >> { %v898_v56 = vmul.f32 %v4630_v16, %v888_v45  ;;  %v922_v55 = vmul.f32 %v4731_v21, %v905_v44  ;;  %v899_v62 = vmul.f32 %v4632_v17, %v894_v49  ;;  %vm913_vm11 = vcmp.gt.f32.partialorder %v905_v44, 0.0  ;;  %v4194_v49 = vld [vmem:[%s5644_s2 + $0x10] sm:$0xff] }
 0x196   : >> { %v921_v5 = vmul.f32 %v4731_v21, %v904_v52  ;;  %vm912_vm12 = vcmp.gt.f32.partialorder %v904_v52, 0.0 }
 0x197   : >> { %v878_v53 = vpop.permute.xlu1 %877  ;;  %v906_v6 = vadd.f32 %v898_v56, %v865_v58  ;;  %v907_v20 = vadd.f32 %v899_v62, %v866_v59  ;;  %v4775_v25 = vsel %vm913_vm11, %v905_v44, %v922_v55 }
 0x198   : >> { %v891_v63 = vsel %vm887_vm10, %v878_v53, %v882_v41  ;;  %v893_v0 = vsel %vm887_vm10, %v874_v23, %v878_v53  ;;  %v4781_v30 = vsel %vm912_vm12, %v904_v52, %v921_v5 }
 0x199   : >> { %v900_v3 = vmul.f32 %v4626_v14, %v893_v0  ;;  %v901_v54 = vmul.f32 %v4628_v15, %v891_v63  ;;  %vm914_vm14 = vcmp.gt.f32.partialorder %v906_v6, 0.0  ;;  %v923_v31 = vmul.f32 %v4731_v21, %v906_v6 }
 0x19a   : >> { %v924_v34 = vmul.f32 %v4731_v21, %v907_v20  ;;  %vm915_vm1 = vcmp.gt.f32.partialorder %v907_v20, 0.0 }
 0x19b   : >> { %v908_v8 = vadd.f32 %v900_v3, %v867_v2  ;;  %v909_v9 = vadd.f32 %v901_v54, %v868_v60  ;;  %v886_v19 = vpop.permute.xlu1 %885 }
 0x19c   : >> { %v889_v22 = vsel %vm887_vm10, %v882_v41, %v886_v19  ;;  %v895_v24 = vsel %vm887_vm10, %v886_v19, %v874_v23  ;;  %v4799_v41 = vsel %vm914_vm14, %v906_v6, %v923_v31  ;;  %v4803_v43 = vsel %vm915_vm1, %v907_v20, %v924_v34 }
 0x19d   : >> { %vm916_vm13 = vcmp.gt.f32.partialorder %v908_v8, 0.0  ;;  %v925_v26 = vmul.f32 %v4731_v21, %v908_v8  ;;  %v926_v27 = vmul.f32 %v4731_v21, %v909_v9  ;;  %v902_v28 = vmul.f32 %v4630_v16, %v889_v22  ;;  %v4210_v22 = vld [vmem:[%s5645_s3 + $0x20] sm:$0xff] }
 0x19e   : >> { %v903_v29 = vmul.f32 %v4632_v17, %v895_v24  ;;  %vm917_vm15 = vcmp.gt.f32.partialorder %v909_v9, 0.0  ;;  %v4211_v24 = vld [vmem:[%s5645_s3 + $0x28] sm:$0xff] }
 0x19f   : >> { %v910_v32 = vadd.f32 %v902_v28, %v869_v4  ;;  %v4784_v33 = vsel %vm917_vm15, %v909_v9, %v926_v27  ;;  %v4786_v23 = vsel %vm916_vm13, %v908_v8, %v925_v26 }
 0x1a0   : >> { %v911_v35 = vadd.f32 %v903_v29, %v870_v7  ;;  %v4301_v36 = vpack.c.bf16 %v4784_v33, %v4775_v25  ;;  %v4303_v37 = vpack.c.bf16 %v4786_v23, %v4781_v30 }
 0x1a1   : >> { %vm918_vm0 = vcmp.gt.f32.partialorder %v910_v32, 0.0  ;;  %v927_v38 = vmul.f32 %v4731_v21, %v910_v32 }
 0x1a2   : >> { %v928_v39 = vmul.f32 %v4731_v21, %v911_v35  ;;  %4302 = vmatprep.subr.bf16.mxu0 %v4301_v36  ;;  %vm919_vm2 = vcmp.gt.f32.partialorder %v911_v35, 0.0 }
 0x1a3   : >> { %4304 = vmatpush1.bf16.msra.mxu0 %v4303_v37  ;;  %v4801_v42 = vsel %vm918_vm0, %v910_v32, %v927_v38 }
 0x1a4   : >> { %4310 = vmatprep.subr.bf16.mxu0 %v4301_v36  ;;  %v4805_v44 = vsel %vm919_vm2, %v911_v35, %v928_v39  ;;  %v4307_v21 = vpack.c.bf16 %v4801_v42, %v4799_v41  ;;  %v1273_v26 = vpop.permute.xlu0 %1272 }
 0x1a5   : >> { %v4305_v45 = vpack.c.bf16 %v4805_v44, %v4803_v43 }
 0x1a6   : >> { %4196 = vmatmul.mubr.msk.f32.vlgmr.msra.gmra.mrb[12].mxu0 %vm946_vm3, %v944_v40 }
 0x1a7   : >> { %4306 = vmatprep.subr.bf16.mxu1 %v4305_v45  ;;  %4312 = vmatpush1.bf16.msra.mxu0 %v4303_v37 }
 0x1a8   : >> { %4308 = vmatpush1.bf16.msra.mxu1 %v4307_v21  ;;  %4318 = vmatprep.subr.bf16.mxu0 %v4301_v36 }
 0x1a9   : >> { %4314 = vmatprep.subr.bf16.mxu1 %v4305_v45  ;;  %1023 = vmatprep.mubr.f32.mxu0 %v4524_v18 }
 0x1aa   : >> { %4197 = vmatmul.mubr.msk.f32.gmra.mrb[14].mxu0 %vm946_vm3, %v945_v46 }
 0x1ab   : >> { %4198 = vmatmul.mubr.msk.f32.vlgmr.msra.gmra.mrb[12].mxu1 %vm946_vm3, %v944_v40  ;;  %1180 = vmatprep.mubr.f32.mxu0 %v4524_v18 }
 0x1ac   : >> { %4316 = vmatpush1.bf16.msra.mxu1 %v4307_v21  ;;  %1100 = vmatprep.mubr.f32.mxu1 %v4524_v18  ;;  %v4876_v27 = vpop.permute.xlu1 %1277 }
 0x1ad   : >> { %4322 = vmatprep.subr.bf16.mxu1 %v4305_v45 }
 0x1ae   : >> { %4202 = vmatmul.mubr.msk.f32.vlgmr.msra.gmra.mrb[16].mxu0 %vm946_vm3, %v4200_v47 }
 0x1af   : >> { %4199 = vmatmul.mubr.msk.f32.gmra.mrb[14].mxu1 %vm946_vm3, %v945_v46  ;;  %4320 = vmatpush1.bf16.msra.mxu0 %v4303_v37 }
 0x1b0   : >> { %1186 = vmatprep.mubr.f32.mxu0 %v4524_v18  ;;  %1257 = vmatprep.mubr.f32.mxu1 %v4524_v18 }
 0x1b2   : >> { %4203 = vmatmul.mubr.msk.f32.gmra.mrb[18].mxu0 %vm946_vm3, %v4201_v48 }
 0x1b3   : >> { %4204 = vmatmul.mubr.msk.f32.vlgmr.msra.gmra.mrb[16].mxu1 %vm946_vm3, %v4200_v47  ;;  %1350 = vmatprep.mubr.f32.mxu0 %v4524_v18 }
 0x1b4   : >> { %4324 = vmatpush1.bf16.msra.mxu1 %v4307_v21  ;;  %1263 = vmatprep.mubr.f32.mxu1 %v4524_v18 }
 0x1b6   : >> { %4206 = vmatmul.mubr.msk.f32.vlgmr.msra.gmra.mrb[20].mxu0 %vm946_vm3, %v4194_v49 }
 0x1b7   : >> { %4205 = vmatmul.mubr.msk.f32.gmra.mrb[18].mxu1 %vm946_vm3, %v4201_v48  ;;  %1356 = vmatprep.mubr.f32.mxu0 %v4524_v18 }
 0x1b8   : >> { %1427 = vmatprep.mubr.f32.mxu1 %v4524_v18 }
 0x1ba   : >> { %4207 = vmatmul.mubr.msk.f32.gmra.mrb[22].mxu0 %vm946_vm3, %v4195_v50 }
 0x1bb   : >> { %4208 = vmatmul.mubr.msk.f32.vlgmr.msra.gmra.mrb[20].mxu1 %vm946_vm3, %v4194_v49  ;;  %1633 = vmatprep.mubr.f32.mxu0 %v4524_v18 }
 0x1bc   : >> { %1433 = vmatprep.mubr.f32.mxu1 %v4524_v18 }
 0x1bf   : >> { %4209 = vmatmul.mubr.msk.f32.gmra.mrb[22].mxu1 %vm946_vm3, %v4195_v50 }
 0x1c0   : >> { %1710 = vmatprep.mubr.f32.mxu1 %v4524_v18 }
 0x279   : >> { %v1019_v51 = vpop.f32.mrb[12].mxu0 }
 0x27a   : >> { %1440 = vrot.lane.b32.xlu0 %v1019_v51, %s4526_s27  ;;  %v1021_v52 = vpop.f32.mrb[13].mxu0 }
 0x27d   : >> { %v1025_v56 = vpop.f32.mrb[14].mxu0 }
 0x27e   : >> { %v1096_v57 = vpop.f32.mrb[12].mxu1  ;;  %1442 = vrot.lane.b32.xlu1 %v1025_v56, %s4526_s27  ;;  %v1027_v58 = vpop.f32.mrb[15].mxu0 }
 0x27f   : >> { %v1098_v60 = vpop.f32.mrb[13].mxu1  ;;  %1448 = vrot.lane.b32.xlu0 %v1096_v57, %s4526_s27 }
 0x281   : >> { %v1182_v61 = vpop.f32.mrb[16].mxu0 }
 0x282   : >> { %v1102_v53 = vpop.f32.mrb[14].mxu1  ;;  %v1184_v55 = vpop.f32.mrb[17].mxu0 }
 0x283   : >> { %v1104_v62 = vpop.f32.mrb[15].mxu1  ;;  %1444 = vrot.lane.b32.xlu0 %v1021_v52, %s4526_s27  ;;  %1450 = vrot.lane.b32.xlu1 %v1102_v53, %s4526_s27  ;;  %v4890_v52 = vstv %s4193_s12 }
 0x285   : >> { %v1188_v63 = vpop.f32.mrb[18].mxu0 }
 0x286   : >> { %v1190_v0 = vpop.f32.mrb[19].mxu0  ;;  %v1259_v2 = vpop.f32.mrb[16].mxu1 }
 0x287   : >> { %1452 = vrot.lane.b32.xlu0 %v1098_v60, %s4526_s27  ;;  %1446 = vrot.lane.b32.xlu1 %v1027_v58, %s4526_s27  ;;  %v1261_v3 = vpop.f32.mrb[17].mxu1 }
 0x289   : >> { %v1352_v54 = vpop.f32.mrb[20].mxu0 }
 0x28a   : >> { %v1354_v59 = vpop.f32.mrb[21].mxu0  ;;  %v1265_v4 = vpop.f32.mrb[18].mxu1  ;;  %v1353_v50 = vadd.f32 %v1352_v54, %v1273_v26 }
 0x28b   : >> { %1454 = vrot.lane.b32.xlu1 %v1104_v62, %s4526_s27  ;;  %1480 = vrot.lane.b32.xlu0 %v1182_v61, %s4527_s28  ;;  %v1267_v5 = vpop.f32.mrb[19].mxu1  ;;  %v1355_v56 = vadd.f32 %v1354_v59, %v1273_v26 }
 0x28d   : >> { %v1358_v6 = vpop.f32.mrb[22].mxu0 }
 0x28e   : >> { %v1429_v7 = vpop.f32.mrb[20].mxu1  ;;  %v1360_v8 = vpop.f32.mrb[23].mxu0 }
 0x28f   : >> { %v1431_v9 = vpop.f32.mrb[21].mxu1  ;;  %1488 = vrot.lane.b32.xlu0 %v1259_v2, %s4527_s28  ;;  %1482 = vrot.lane.b32.xlu1 %v1188_v63, %s4527_s28  ;;  %v1430_v57 = vadd.f32 %v1429_v7, %v1273_v26  ;;  %v1361_v61 = vadd.f32 %v1360_v8, %v4876_v27 }
 0x290   : >> { %v1432_v2 = vadd.f32 %v1431_v9, %v1273_v26 }
 0x292   : >> { %v4861_v19 = vpop.f32.mrb[22].mxu1 }
 0x293   : >> { %1484 = vrot.lane.b32.xlu0 %v1184_v55, %s4527_s28  ;;  %1490 = vrot.lane.b32.xlu1 %v1265_v4, %s4527_s28  ;;  %v4865_v20 = vpop.f32.mrb[23].mxu1 }
 0x297   : >> { %1492 = vrot.lane.b32.xlu0 %v1261_v3, %s4527_s28  ;;  %1486 = vrot.lane.b32.xlu1 %v1190_v0, %s4527_s28 }
 0x29b   : >> { %1888 = vperm.xlu0 %4469, %v4210_v22   ;;  %1494 = vrot.lane.b32.xlu1 %v1267_v5, %s4527_s28  ;;  %v1359_v22 = vadd.f32 %v1358_v6, %v4876_v27 }
 0x29f   : >> { %1893 = vperm.xlu1 %4470, %v4211_v24  }
 0x2ec   : >> { %v1441_v28 = vpop.permute.xlu0 %1440 }
 0x2f0   : >> { %v1443_v29 = vpop.permute.xlu1 %1442 }
 0x2f1   : >> { %v1449_v31 = vpop.permute.xlu0 %1448 }
 0x2f5   : >> { %v1445_v32 = vpop.permute.xlu0 %1444  ;;  %v1451_v34 = vpop.permute.xlu1 %1450 }
 0x2f6   : >> { %v1460_v39 = vsel %vm846_vm9, %v1441_v28, %v1445_v32  ;;  %v1458_v21 = vsel %vm846_vm9, %v1445_v32, %v1449_v31 }
 0x2f7   : >> { %v1465_v47 = vmul.f32 %v4620_v11, %v1460_v39  ;;  %v1466_v58 = vmul.f32 %v4622_v12, %v1458_v21 }
 0x2f9   : >> { %v1453_v35 = vpop.permute.xlu0 %1452  ;;  %v1447_v36 = vpop.permute.xlu1 %1446  ;;  %v1473_v3 = vadd.f32 %v1465_v47, %v1355_v56  ;;  %v1474_v24 = vadd.f32 %v1466_v58, %v1430_v57  ;;  %v1438_v56 = vadd.f32 %v4865_v20, %v4876_v27 }
 0x2fa   : >> { %v1462_v40 = vsel %vm846_vm9, %v1453_v35, %v1441_v28  ;;  %v1456_v48 = vsel %vm846_vm9, %v1449_v31, %v1453_v35  ;;  %v1461_v49 = vsel %vm846_vm9, %v1443_v29, %v1447_v36  ;;  %v1459_v55 = vsel %vm846_vm9, %v1447_v36, %v1451_v34 }
 0x2fb   : >> { %v1464_v51 = vmul.f32 %v4618_v10, %v1462_v40  ;;  %v1467_v53 = vmul.f32 %v4624_v13, %v1456_v48  ;;  %v1469_v62 = vmul.f32 %v4620_v11, %v1461_v49  ;;  %v1470_v28 = vmul.f32 %v4622_v12, %v1459_v55 }
 0x2fd   : >> { %v1455_v37 = vpop.permute.xlu1 %1454  ;;  %v1481_v38 = vpop.permute.xlu0 %1480  ;;  %v1472_v4 = vadd.f32 %v1464_v51, %v1353_v50  ;;  %v1475_v26 = vadd.f32 %v1467_v53, %v1432_v2  ;;  %v1436_v51 = vadd.f32 %v4861_v19, %v4876_v27 }
 0x2fe   : >> { %v1463_v60 = vsel %vm846_vm9, %v1455_v37, %v1443_v29  ;;  %v1457_v9 = vsel %vm846_vm9, %v1451_v34, %v1455_v37  ;;  %v1477_v29 = vadd.f32 %v1469_v62, %v1361_v61 }
 0x2ff   : >> { %v1468_v5 = vmul.f32 %v4618_v10, %v1463_v60  ;;  %v1471_v34 = vmul.f32 %v4624_v13, %v1457_v9  ;;  %v1478_v55 = vadd.f32 %v1470_v28, %v1436_v51 }
 0x301   : >> { %v1489_v45 = vpop.permute.xlu0 %1488  ;;  %v1483_v46 = vpop.permute.xlu1 %1482  ;;  %v1476_v37 = vadd.f32 %v1468_v5, %v1359_v22  ;;  %v1479_v62 = vadd.f32 %v1471_v34, %v1438_v56  ;;  %v4214_v34 = vld [vmem:[%s5644_s2 + $0x48] sm:$0xff] }
 0x305   : >> { %v1485_v63 = vpop.permute.xlu0 %1484  ;;  %v1491_v0 = vpop.permute.xlu1 %1490 }
 0x306   : >> { %v1498_v54 = vsel %vm887_vm10, %v1485_v63, %v1489_v45  ;;  %v1500_v59 = vsel %vm887_vm10, %v1481_v38, %v1485_v63 }
 0x307   : >> { %v1504_v7 = vmul.f32 %v4626_v14, %v1500_v59  ;;  %v1505_v8 = vmul.f32 %v4628_v15, %v1498_v54 }
 0x309   : >> { %v1512_v31 = vadd.f32 %v1504_v7, %v1472_v4  ;;  %v1513_v32 = vadd.f32 %v1505_v8, %v1473_v3  ;;  %v1493_v35 = vpop.permute.xlu0 %1492  ;;  %v1487_v36 = vpop.permute.xlu1 %1486 }
 0x30a   : >> { %v1496_v39 = vsel %vm887_vm10, %v1489_v45, %v1493_v35  ;;  %v1502_v40 = vsel %vm887_vm10, %v1493_v35, %v1481_v38  ;;  %v1499_v6 = vsel %vm887_vm10, %v1487_v36, %v1491_v0  ;;  %v1501_v21 = vsel %vm887_vm10, %v1483_v46, %v1487_v36 }
 0x30b   : >> { %v1529_v47 = vmul.f32 %v4890_v52, %v1512_v31  ;;  %v1530_v48 = vmul.f32 %v4890_v52, %v1513_v32  ;;  %v1506_v49 = vmul.f32 %v4630_v16, %v1496_v39  ;;  %v1507_v45 = vmul.f32 %v4632_v17, %v1502_v40  ;;  %v4215_v40 = vld [vmem:[%s5644_s2 + $0x30] sm:$0xff] }
 0x30c   : >> { %v1508_v50 = vmul.f32 %v4626_v14, %v1501_v21  ;;  %v1509_v38 = vmul.f32 %v4628_v15, %v1499_v6  ;;  %vm1520_vm4 = vcmp.gt.f32.partialorder %v1512_v31, 0.0  ;;  %vm1521_vm5 = vcmp.gt.f32.partialorder %v1513_v32, 0.0  ;;  %v4213_v21 = vld [vmem:[%s5644_s2 + $0x40] sm:$0xff] }
 0x30d   : >> { %v1495_v57 = vpop.permute.xlu1 %1494  ;;  %v1514_v58 = vadd.f32 %v1506_v49, %v1474_v24  ;;  %v1515_v60 = vadd.f32 %v1507_v45, %v1475_v26  ;;  %v1537_v3 = vsel %vm1520_vm4, %v1512_v31, %v1529_v47  ;;  %v1538_v27 = vsel %vm1521_vm5, %v1513_v32, %v1530_v48 }
 0x30e   : >> { %v1516_v61 = vadd.f32 %v1508_v50, %v1476_v37  ;;  %v1517_v53 = vadd.f32 %v1509_v38, %v1477_v29  ;;  %v1497_v63 = vsel %vm887_vm10, %v1491_v0, %v1495_v57  ;;  %v1503_v2 = vsel %vm887_vm10, %v1495_v57, %v1483_v46 }
 0x30f   : >> { %v1531_v19 = vmul.f32 %v4890_v52, %v1514_v58  ;;  %v1532_v20 = vmul.f32 %v4890_v52, %v1515_v60  ;;  %vm1522_vm8 = vcmp.gt.f32.partialorder %v1514_v58, 0.0  ;;  %vm1523_vm11 = vcmp.gt.f32.partialorder %v1515_v60, 0.0 }
 0x310   : >> { %vm1524_vm6 = vcmp.gt.f32.partialorder %v1516_v61, 0.0  ;;  %vm1525_vm7 = vcmp.gt.f32.partialorder %v1517_v53, 0.0  ;;  %v1533_v54 = vmul.f32 %v4890_v52, %v1516_v61  ;;  %v1534_v59 = vmul.f32 %v4890_v52, %v1517_v53 }
 0x311   : >> { %v1510_v4 = vmul.f32 %v4630_v16, %v1497_v63  ;;  %v1511_v0 = vmul.f32 %v4632_v17, %v1503_v2  ;;  %v1539_v28 = vsel %vm1522_vm8, %v1514_v58, %v1531_v19  ;;  %v4947_v9 = vadd.f32 %v1538_v27, %v4775_v25 }
 0x312   : >> { %v1541_v5 = vsel %vm1524_vm6, %v1516_v61, %v1533_v54  ;;  %v1542_v46 = vsel %vm1525_vm7, %v1517_v53, %v1534_v59  ;;  %v4950_v26 = vadd.f32 %v1537_v3, %v4781_v30  ;;  %v1540_v29 = vsel %vm1523_vm11, %v1515_v60, %v1532_v20 }
 0x313   : >> { %v1518_v7 = vadd.f32 %v1510_v4, %v1478_v55  ;;  %v1519_v8 = vadd.f32 %v1511_v0, %v1479_v62  ;;  %v4941_v22 = vadd.f32 %v1542_v46, %v4784_v33  ;;  %v4944_v24 = vadd.f32 %v1541_v5, %v4786_v23  ;;  %v4231_v4 = vld [vmem:[%s5645_s3 + $0x30] sm:$0xff]  ;;  %v4232_v0 = vld [vmem:[%s5645_s3 + $0x38] sm:$0xff] }
 0x314   : >> { %v4959_v25 = vadd.f32 %v1540_v29, %v4803_v43  ;;  %v4965_v39 = vadd.f32 %v1539_v28, %v4799_v41  ;;  %v4216_v41 = vld [vmem:[%s5644_s2 + $0x38] sm:$0xff] }
 0x315   : >> { %vm1526_vm12 = vcmp.gt.f32.partialorder %v1518_v7, 0.0  ;;  %vm1527_vm13 = vcmp.gt.f32.partialorder %v1519_v8, 0.0  ;;  %v1535_v31 = vmul.f32 %v4890_v52, %v1518_v7  ;;  %v1536_v32 = vmul.f32 %v4890_v52, %v1519_v8 }
 0x316   : >> { %v4325_v33 = vpack.c.bf16 %v4941_v22, %v4947_v9  ;;  %v4327_v23 = vpack.c.bf16 %v4944_v24, %v4950_v26 }
 0x317   : >> { %v1543_v35 = vsel %vm1526_vm12, %v1518_v7, %v1535_v31  ;;  %v1544_v36 = vsel %vm1527_vm13, %v1519_v8, %v1536_v32 }
 0x318   : >> { %4326 = vmatprep.subr.bf16.mxu0 %v4325_v33  ;;  %v4962_v30 = vadd.f32 %v1544_v36, %v4805_v44  ;;  %v4968_v52 = vadd.f32 %v1543_v35, %v4801_v42  ;;  %v4221_v42 = vld [vmem:[%s5644_s2 + $0x50] sm:$0xff]  ;;  %v4222_v44 = vld [vmem:[%s5644_s2 + $0x58] sm:$0xff] }
 0x319   : >> { %4328 = vmatpush1.bf16.msra.mxu0 %v4327_v23 }
 0x31a   : >> { %4334 = vmatprep.subr.bf16.mxu0 %v4325_v33  ;;  %v4329_v6 = vpack.c.bf16 %v4962_v30, %v4959_v25  ;;  %v4331_v43 = vpack.c.bf16 %v4968_v52, %v4965_v39  ;;  %v1889_v5 = vpop.permute.xlu0 %1888 }
 0x31c   : >> { %4217 = vmatmul.mubr.msk.f32.vlgmr.msra.gmra.mrb[24].mxu0 %vm946_vm3, %v4215_v40  ;;  %4330 = vmatprep.subr.bf16.mxu1 %v4329_v6 }
 0x31d   : >> { %4332 = vmatpush1.bf16.msra.mxu1 %v4331_v43  ;;  %4336 = vmatpush1.bf16.msra.mxu0 %v4327_v23 }
 0x31e   : >> { %4338 = vmatprep.subr.bf16.mxu1 %v4329_v6  ;;  %4342 = vmatprep.subr.bf16.mxu0 %v4325_v33  ;;  %v5042_v46 = vpop.permute.xlu1 %1893 }
 0x31f   : >> { %1639 = vmatprep.mubr.f32.mxu0 %v4524_v18 }
 0x320   : >> { %4219 = vmatmul.mubr.msk.f32.vlgmr.msra.gmra.mrb[24].mxu1 %vm946_vm3, %v4215_v40  ;;  %4218 = vmatmul.mubr.msk.f32.gmra.mrb[26].mxu0 %vm946_vm3, %v4216_v41 }
 0x321   : >> { %4340 = vmatpush1.bf16.msra.mxu1 %v4331_v43  ;;  %1716 = vmatprep.mubr.f32.mxu1 %v4524_v18 }
 0x322   : >> { %4346 = vmatprep.subr.bf16.mxu1 %v4329_v6  ;;  %1796 = vmatprep.mubr.f32.mxu0 %v4524_v18 }
 0x324   : >> { %4220 = vmatmul.mubr.msk.f32.gmra.mrb[26].mxu1 %vm946_vm3, %v4216_v41  ;;  %4223 = vmatmul.mubr.msk.f32.vlgmr.msra.gmra.mrb[28].mxu0 %vm946_vm3, %v4221_v42 }
 0x325   : >> { %4344 = vmatpush1.bf16.msra.mxu0 %v4327_v23  ;;  %1802 = vmatprep.mubr.f32.mxu0 %v4524_v18 }
 0x326   : >> { %1873 = vmatprep.mubr.f32.mxu1 %v4524_v18 }
 0x328   : >> { %4224 = vmatmul.mubr.msk.f32.gmra.mrb[30].mxu0 %vm946_vm3, %v4222_v44  ;;  %4225 = vmatmul.mubr.msk.f32.vlgmr.msra.gmra.mrb[28].mxu1 %vm946_vm3, %v4221_v42 }
 0x329   : >> { %4348 = vmatpush1.bf16.msra.mxu1 %v4331_v43  ;;  %1879 = vmatprep.mubr.f32.mxu1 %v4524_v18 }
 0x32a   : >> { %1966 = vmatprep.mubr.f32.mxu0 %v4524_v18 }
 0x32c   : >> { %4226 = vmatmul.mubr.msk.f32.gmra.mrb[30].mxu1 %vm946_vm3, %v4222_v44  ;;  %4227 = vmatmul.mubr.msk.f32.vlgmr.msra.gmra.mrb[32].mxu0 %vm946_vm3, %v4213_v21 }
 0x32d   : >> { %1972 = vmatprep.mubr.f32.mxu0 %v4524_v18  ;;  %2043 = vmatprep.mubr.f32.mxu1 %v4524_v18 }
 0x330   : >> { %4228 = vmatmul.mubr.msk.f32.gmra.mrb[34].mxu0 %vm946_vm3, %v4214_v34  ;;  %4229 = vmatmul.mubr.msk.f32.vlgmr.msra.gmra.mrb[32].mxu1 %vm946_vm3, %v4213_v21 }
 0x331   : >> { %2049 = vmatprep.mubr.f32.mxu1 %v4524_v18  ;;  %2249 = vmatprep.mubr.f32.mxu0 %v4524_v18 }
 0x334   : >> { %4230 = vmatmul.mubr.msk.f32.gmra.mrb[34].mxu1 %vm946_vm3, %v4214_v34 }
 0x335   : >> { %2326 = vmatprep.mubr.f32.mxu1 %v4524_v18 }
 0x3ef   : >> { %v1635_v37 = vpop.f32.mrb[24].mxu0 }
 0x3f0   : >> { %2056 = vrot.lane.b32.xlu0 %v1635_v37, %s4526_s27  ;;  %v1637_v47 = vpop.f32.mrb[25].mxu0 }
 0x3f3   : >> { %v1641_v48 = vpop.f32.mrb[26].mxu0  ;;  %v1712_v49 = vpop.f32.mrb[24].mxu1 }
 0x3f4   : >> { %v1714_v45 = vpop.f32.mrb[25].mxu1  ;;  %2064 = vrot.lane.b32.xlu0 %v1712_v49, %s4526_s27  ;;  %2058 = vrot.lane.b32.xlu1 %v1641_v48, %s4526_s27  ;;  %v1643_v50 = vpop.f32.mrb[27].mxu0 }
 0x3f7   : >> { %v1718_v38 = vpop.f32.mrb[26].mxu1  ;;  %v1798_v51 = vpop.f32.mrb[28].mxu0 }
 0x3f8   : >> { %v1720_v56 = vpop.f32.mrb[27].mxu1  ;;  %2060 = vrot.lane.b32.xlu0 %v1637_v47, %s4526_s27  ;;  %2066 = vrot.lane.b32.xlu1 %v1718_v38, %s4526_s27  ;;  %v1800_v57 = vpop.f32.mrb[29].mxu0  ;;  %v5056_v47 = vstv %s4212_s20 }
 0x3fb   : >> { %v1804_v58 = vpop.f32.mrb[30].mxu0  ;;  %v1875_v60 = vpop.f32.mrb[28].mxu1 }
 0x3fc   : >> { %2068 = vrot.lane.b32.xlu0 %v1714_v45, %s4526_s27  ;;  %2062 = vrot.lane.b32.xlu1 %v1643_v50, %s4526_s27  ;;  %v1806_v61 = vpop.f32.mrb[31].mxu0  ;;  %v1877_v53 = vpop.f32.mrb[29].mxu1 }
 0x3ff   : >> { %v1968_v55 = vpop.f32.mrb[32].mxu0  ;;  %v1881_v62 = vpop.f32.mrb[30].mxu1 }
 0x400   : >> { %2070 = vrot.lane.b32.xlu1 %v1720_v56, %s4526_s27  ;;  %2096 = vrot.lane.b32.xlu0 %v1798_v51, %s4527_s28  ;;  %v1970_v63 = vpop.f32.mrb[33].mxu0  ;;  %v1883_v2 = vpop.f32.mrb[31].mxu1  ;;  %v1969_v34 = vadd.f32 %v1968_v55, %v1889_v5 }
 0x401   : >> { %v1971_v48 = vadd.f32 %v1970_v63, %v1889_v5 }
 0x403   : >> { %v1974_v3 = vpop.f32.mrb[34].mxu0  ;;  %v2045_v19 = vpop.f32.mrb[32].mxu1 }
 0x404   : >> { %v2047_v20 = vpop.f32.mrb[33].mxu1  ;;  %2104 = vrot.lane.b32.xlu0 %v1875_v60, %s4527_s28  ;;  %2098 = vrot.lane.b32.xlu1 %v1804_v58, %s4527_s28  ;;  %v1976_v27 = vpop.f32.mrb[35].mxu0  ;;  %v2046_v49 = vadd.f32 %v2045_v19, %v1889_v5 }
 0x405   : >> { %v2048_v38 = vadd.f32 %v2047_v20, %v1889_v5 }
 0x407   : >> { %v5027_v54 = vpop.f32.mrb[34].mxu1 }
 0x408   : >> { %v5029_v59 = vpop.f32.mrb[35].mxu1  ;;  %2100 = vrot.lane.b32.xlu0 %v1800_v57, %s4527_s28  ;;  %2106 = vrot.lane.b32.xlu1 %v1881_v62, %s4527_s28 }
 0x40c   : >> { %2108 = vrot.lane.b32.xlu0 %v1877_v53, %s4527_s28  ;;  %2102 = vrot.lane.b32.xlu1 %v1806_v61, %s4527_s28  ;;  %v1977_v61 = vadd.f32 %v1976_v27, %v5042_v46 }
 0x410   : >> { %2504 = vperm.xlu0 %4469, %v4231_v4   ;;  %2110 = vrot.lane.b32.xlu1 %v1883_v2, %s4527_s28  ;;  %v1975_v4 = vadd.f32 %v1974_v3, %v5042_v46 }
 0x414   : >> { %2509 = vperm.xlu1 %4470, %v4232_v0  }
 0x462   : >> { %v2057_v7 = vpop.permute.xlu0 %2056 }
 0x466   : >> { %v2065_v8 = vpop.permute.xlu0 %2064  ;;  %v2059_v28 = vpop.permute.xlu1 %2058 }
 0x46a   : >> { %v2061_v29 = vpop.permute.xlu0 %2060  ;;  %v2067_v31 = vpop.permute.xlu1 %2066 }
 0x46b   : >> { %v2076_v36 = vsel %vm846_vm9, %v2057_v7, %v2061_v29  ;;  %v2074_v6 = vsel %vm846_vm9, %v2061_v29, %v2065_v8 }
 0x46c   : >> { %v2081_v42 = vmul.f32 %v4620_v11, %v2076_v36  ;;  %v2082_v45 = vmul.f32 %v4622_v12, %v2074_v6 }
 0x46e   : >> { %v2069_v32 = vpop.permute.xlu0 %2068  ;;  %v2063_v33 = vpop.permute.xlu1 %2062  ;;  %v2089_v53 = vadd.f32 %v2081_v42, %v1971_v48  ;;  %v2090_v0 = vadd.f32 %v2082_v45, %v2046_v49  ;;  %v2054_v48 = vadd.f32 %v5029_v59, %v5042_v46 }
 0x46f   : >> { %v2078_v40 = vsel %vm846_vm9, %v2069_v32, %v2057_v7  ;;  %v2072_v44 = vsel %vm846_vm9, %v2065_v8, %v2069_v32  ;;  %v2077_v21 = vsel %vm846_vm9, %v2059_v28, %v2063_v33  ;;  %v2075_v56 = vsel %vm846_vm9, %v2063_v33, %v2067_v31 }
 0x470   : >> { %v2080_v37 = vmul.f32 %v4618_v10, %v2078_v40  ;;  %v2083_v51 = vmul.f32 %v4624_v13, %v2072_v44  ;;  %v2085_v57 = vmul.f32 %v4620_v11, %v2077_v21  ;;  %v2086_v5 = vmul.f32 %v4622_v12, %v2075_v56 }
 0x472   : >> { %v2071_v23 = vpop.permute.xlu1 %2070  ;;  %v2097_v35 = vpop.permute.xlu0 %2096  ;;  %v2088_v63 = vadd.f32 %v2080_v37, %v1969_v34  ;;  %v2091_v7 = vadd.f32 %v2083_v51, %v2048_v38  ;;  %v2093_v8 = vadd.f32 %v2085_v57, %v1977_v61  ;;  %v2052_v37 = vadd.f32 %v5027_v54, %v5042_v46 }
 0x473   : >> { %v2079_v50 = vsel %vm846_vm9, %v2071_v23, %v2059_v28  ;;  %v2073_v27 = vsel %vm846_vm9, %v2067_v31, %v2071_v23 }
 0x474   : >> { %v2084_v2 = vmul.f32 %v4618_v10, %v2079_v50  ;;  %v2087_v31 = vmul.f32 %v4624_v13, %v2073_v27  ;;  %v2094_v56 = vadd.f32 %v2086_v5, %v2052_v37 }
 0x476   : >> { %v2105_v43 = vpop.permute.xlu0 %2104  ;;  %v2099_v41 = vpop.permute.xlu1 %2098  ;;  %v2092_v23 = vadd.f32 %v2084_v2, %v1975_v4  ;;  %v2095_v57 = vadd.f32 %v2087_v31, %v2054_v48  ;;  %v4235_v31 = vld [vmem:[%s5644_s2 + $0x78] sm:$0xff] }
 0x47a   : >> { %v2101_v58 = vpop.permute.xlu0 %2100  ;;  %v2107_v60 = vpop.permute.xlu1 %2106 }
 0x47b   : >> { %v2114_v55 = vsel %vm887_vm10, %v2101_v58, %v2105_v43  ;;  %v2116_v62 = vsel %vm887_vm10, %v2097_v35, %v2101_v58 }
 0x47c   : >> { %v2120_v19 = vmul.f32 %v4626_v14, %v2116_v62  ;;  %v2121_v20 = vmul.f32 %v4628_v15, %v2114_v55 }
 0x47e   : >> { %v2128_v28 = vadd.f32 %v2120_v19, %v2088_v63  ;;  %v2129_v29 = vadd.f32 %v2121_v20, %v2089_v53  ;;  %v2109_v32 = vpop.permute.xlu0 %2108  ;;  %v2103_v33 = vpop.permute.xlu1 %2102 }
 0x47f   : >> { %v2112_v36 = vsel %vm887_vm10, %v2105_v43, %v2109_v32  ;;  %v2118_v40 = vsel %vm887_vm10, %v2109_v32, %v2097_v35  ;;  %v2115_v3 = vsel %vm887_vm10, %v2103_v33, %v2107_v60  ;;  %v2117_v6 = vsel %vm887_vm10, %v2099_v41, %v2103_v33 }
 0x480   : >> { %v2145_v42 = vmul.f32 %v5056_v47, %v2128_v28  ;;  %v2146_v44 = vmul.f32 %v5056_v47, %v2129_v29  ;;  %v2122_v21 = vmul.f32 %v4630_v16, %v2112_v36  ;;  %v2123_v43 = vmul.f32 %v4632_v17, %v2118_v40  ;;  %v4236_v40 = vld [vmem:[%s5644_s2 + $0x60] sm:$0xff] }
 0x481   : >> { %v2124_v34 = vmul.f32 %v4626_v14, %v2117_v6  ;;  %v2125_v35 = vmul.f32 %v4628_v15, %v2115_v3  ;;  %vm2136_vm14 = vcmp.gt.f32.partialorder %v2128_v28, 0.0  ;;  %vm2137_vm15 = vcmp.gt.f32.partialorder %v2129_v29, 0.0  ;;  %v4234_v6 = vld [vmem:[%s5644_s2 + $0x70] sm:$0xff] }
 0x482   : >> { %v2111_v49 = vpop.permute.xlu1 %2110  ;;  %v2130_v45 = vadd.f32 %v2122_v21, %v2090_v0  ;;  %v2131_v50 = vadd.f32 %v2123_v43, %v2091_v7  ;;  %v2153_v53 = vsel %vm2136_vm14, %v2128_v28, %v2145_v42  ;;  %v2154_v46 = vsel %vm2137_vm15, %v2129_v29, %v2146_v44 }
 0x483   : >> { %v2132_v38 = vadd.f32 %v2124_v34, %v2092_v23  ;;  %v2133_v51 = vadd.f32 %v2125_v35, %v2093_v8  ;;  %v2113_v58 = vsel %vm887_vm10, %v2107_v60, %v2111_v49  ;;  %v2119_v61 = vsel %vm887_vm10, %v2111_v49, %v2099_v41 }
 0x484   : >> { %v2147_v54 = vmul.f32 %v5056_v47, %v2130_v45  ;;  %v2148_v59 = vmul.f32 %v5056_v47, %v2131_v50  ;;  %vm2138_vm2 = vcmp.gt.f32.partialorder %v2130_v45, 0.0  ;;  %vm2139_vm4 = vcmp.gt.f32.partialorder %v2131_v50, 0.0 }
 0x485   : >> { %vm2140_vm0 = vcmp.gt.f32.partialorder %v2132_v38, 0.0  ;;  %vm2141_vm1 = vcmp.gt.f32.partialorder %v2133_v51, 0.0  ;;  %v2149_v55 = vmul.f32 %v5056_v47, %v2132_v38  ;;  %v2150_v62 = vmul.f32 %v5056_v47, %v2133_v51 }
 0x486   : >> { %v2126_v63 = vmul.f32 %v4630_v16, %v2113_v58  ;;  %v2127_v60 = vmul.f32 %v4632_v17, %v2119_v61  ;;  %v2155_v5 = vsel %vm2138_vm2, %v2130_v45, %v2147_v54  ;;  %v5113_v27 = vadd.f32 %v2154_v46, %v4947_v9 }
 0x487   : >> { %v2157_v2 = vsel %vm2140_vm0, %v2132_v38, %v2149_v55  ;;  %v2158_v41 = vsel %vm2141_vm1, %v2133_v51, %v2150_v62  ;;  %v5116_v7 = vadd.f32 %v2153_v53, %v4950_v26  ;;  %v2156_v8 = vsel %vm2139_vm4, %v2131_v50, %v2148_v59 }
 0x488   : >> { %v2134_v19 = vadd.f32 %v2126_v63, %v2094_v56  ;;  %v2135_v20 = vadd.f32 %v2127_v60, %v2095_v57  ;;  %v5107_v4 = vadd.f32 %v2158_v41, %v4941_v22  ;;  %v5110_v0 = vadd.f32 %v2157_v2, %v4944_v24  ;;  %v4252_v63 = vld [vmem:[%s5645_s3 + $0x40] sm:$0xff]  ;;  %v4253_v60 = vld [vmem:[%s5645_s3 + $0x48] sm:$0xff] }
 0x489   : >> { %v5125_v9 = vadd.f32 %v2156_v8, %v4959_v25  ;;  %v5131_v36 = vadd.f32 %v2155_v5, %v4965_v39  ;;  %v4242_v39 = vld [vmem:[%s5644_s2 + $0x80] sm:$0xff] }
 0x48a   : >> { %vm2142_vm5 = vcmp.gt.f32.partialorder %v2134_v19, 0.0  ;;  %vm2143_vm6 = vcmp.gt.f32.partialorder %v2135_v20, 0.0  ;;  %v2151_v28 = vmul.f32 %v5056_v47, %v2134_v19  ;;  %v2152_v29 = vmul.f32 %v5056_v47, %v2135_v20 }
 0x48b   : >> { %v4349_v22 = vpack.c.bf16 %v5107_v4, %v5113_v27  ;;  %v4351_v24 = vpack.c.bf16 %v5110_v0, %v5116_v7 }
 0x48c   : >> { %v2159_v32 = vsel %vm2142_vm5, %v2134_v19, %v2151_v28  ;;  %v2160_v33 = vsel %vm2143_vm6, %v2135_v20, %v2152_v29 }
 0x48d   : >> { %4350 = vmatprep.subr.bf16.mxu0 %v4349_v22  ;;  %v5128_v26 = vadd.f32 %v2160_v33, %v4962_v30  ;;  %v5134_v47 = vadd.f32 %v2159_v32, %v4968_v52  ;;  %v4237_v30 = vld [vmem:[%s5644_s2 + $0x68] sm:$0xff] }
 0x48e   : >> { %4352 = vmatpush1.bf16.msra.mxu0 %v4351_v24  ;;  %v4243_v52 = vld [vmem:[%s5644_s2 + $0x88] sm:$0xff] }
 0x48f   : >> { %4358 = vmatprep.subr.bf16.mxu0 %v4349_v22  ;;  %v4353_v3 = vpack.c.bf16 %v5128_v26, %v5125_v9  ;;  %v4355_v25 = vpack.c.bf16 %v5134_v47, %v5131_v36  ;;  %v2505_v2 = vpop.permute.xlu0 %2504 }
 0x491   : >> { %4238 = vmatmul.mubr.msk.f32.vlgmr.msra.gmra.mrb[36].mxu0 %vm946_vm3, %v4236_v40  ;;  %4354 = vmatprep.subr.bf16.mxu1 %v4353_v3 }
 0x492   : >> { %4356 = vmatpush1.bf16.msra.mxu1 %v4355_v25  ;;  %4360 = vmatpush1.bf16.msra.mxu0 %v4351_v24 }
 0x493   : >> { %4362 = vmatprep.subr.bf16.mxu1 %v4353_v3  ;;  %4366 = vmatprep.subr.bf16.mxu0 %v4349_v22  ;;  %v5208_v41 = vpop.permute.xlu1 %2509 }
 0x494   : >> { %2255 = vmatprep.mubr.f32.mxu0 %v4524_v18 }
 0x495   : >> { %4240 = vmatmul.mubr.msk.f32.vlgmr.msra.gmra.mrb[36].mxu1 %vm946_vm3, %v4236_v40  ;;  %4239 = vmatmul.mubr.msk.f32.gmra.mrb[38].mxu0 %vm946_vm3, %v4237_v30 }
 0x496   : >> { %4364 = vmatpush1.bf16.msra.mxu1 %v4355_v25  ;;  %2332 = vmatprep.mubr.f32.mxu1 %v4524_v18 }
 0x497   : >> { %4370 = vmatprep.subr.bf16.mxu1 %v4353_v3  ;;  %2412 = vmatprep.mubr.f32.mxu0 %v4524_v18 }
 0x499   : >> { %4241 = vmatmul.mubr.msk.f32.gmra.mrb[38].mxu1 %vm946_vm3, %v4237_v30  ;;  %4244 = vmatmul.mubr.msk.f32.vlgmr.msra.gmra.mrb[40].mxu0 %vm946_vm3, %v4242_v39 }
 0x49a   : >> { %4368 = vmatpush1.bf16.msra.mxu0 %v4351_v24  ;;  %2418 = vmatprep.mubr.f32.mxu0 %v4524_v18 }
 0x49b   : >> { %2489 = vmatprep.mubr.f32.mxu1 %v4524_v18 }
 0x49d   : >> { %4245 = vmatmul.mubr.msk.f32.gmra.mrb[42].mxu0 %vm946_vm3, %v4243_v52  ;;  %4246 = vmatmul.mubr.msk.f32.vlgmr.msra.gmra.mrb[40].mxu1 %vm946_vm3, %v4242_v39 }
 0x49e   : >> { %4372 = vmatpush1.bf16.msra.mxu1 %v4355_v25  ;;  %2495 = vmatprep.mubr.f32.mxu1 %v4524_v18 }
 0x49f   : >> { %2582 = vmatprep.mubr.f32.mxu0 %v4524_v18 }
 0x4a1   : >> { %4247 = vmatmul.mubr.msk.f32.gmra.mrb[42].mxu1 %vm946_vm3, %v4243_v52  ;;  %4248 = vmatmul.mubr.msk.f32.vlgmr.msra.gmra.mrb[44].mxu0 %vm946_vm3, %v4234_v6 }
 0x4a2   : >> { %2588 = vmatprep.mubr.f32.mxu0 %v4524_v18  ;;  %2659 = vmatprep.mubr.f32.mxu1 %v4524_v18 }
 0x4a5   : >> { %4249 = vmatmul.mubr.msk.f32.gmra.mrb[46].mxu0 %vm946_vm3, %v4235_v31  ;;  %4250 = vmatmul.mubr.msk.f32.vlgmr.msra.gmra.mrb[44].mxu1 %vm946_vm3, %v4234_v6 }
 0x4a6   : >> { %2665 = vmatprep.mubr.f32.mxu1 %v4524_v18  ;;  %2865 = vmatprep.mubr.f32.mxu0 %v4524_v18 }
 0x4a9   : >> { %4251 = vmatmul.mubr.msk.f32.gmra.mrb[46].mxu1 %vm946_vm3, %v4235_v31 }
 0x4aa   : >> { %2942 = vmatprep.mubr.f32.mxu1 %v4524_v18 }
 0x564   : >> { %v2251_v23 = vpop.f32.mrb[36].mxu0 }
 0x565   : >> { %2672 = vrot.lane.b32.xlu0 %v2251_v23, %s4526_s27  ;;  %v2253_v42 = vpop.f32.mrb[37].mxu0 }
 0x568   : >> { %v2257_v44 = vpop.f32.mrb[38].mxu0  ;;  %v2328_v21 = vpop.f32.mrb[36].mxu1 }
 0x569   : >> { %v2330_v43 = vpop.f32.mrb[37].mxu1  ;;  %2680 = vrot.lane.b32.xlu0 %v2328_v21, %s4526_s27  ;;  %2674 = vrot.lane.b32.xlu1 %v2257_v44, %s4526_s27  ;;  %v2259_v34 = vpop.f32.mrb[39].mxu0 }
 0x56c   : >> { %v2334_v35 = vpop.f32.mrb[38].mxu1  ;;  %v2414_v37 = vpop.f32.mrb[40].mxu0 }
 0x56d   : >> { %v2336_v48 = vpop.f32.mrb[39].mxu1  ;;  %2676 = vrot.lane.b32.xlu0 %v2253_v42, %s4526_s27  ;;  %2682 = vrot.lane.b32.xlu1 %v2334_v35, %s4526_s27  ;;  %v2416_v49 = vpop.f32.mrb[41].mxu0  ;;  %v5222_v42 = vstv %s4233_s7 }
 0x570   : >> { %v2420_v45 = vpop.f32.mrb[42].mxu0  ;;  %v2491_v50 = vpop.f32.mrb[40].mxu1 }
 0x571   : >> { %2684 = vrot.lane.b32.xlu0 %v2330_v43, %s4526_s27  ;;  %2678 = vrot.lane.b32.xlu1 %v2259_v34, %s4526_s27  ;;  %v2422_v38 = vpop.f32.mrb[43].mxu0  ;;  %v2493_v51 = vpop.f32.mrb[41].mxu1 }
 0x574   : >> { %v2584_v56 = vpop.f32.mrb[44].mxu0  ;;  %v2497_v57 = vpop.f32.mrb[42].mxu1 }
 0x575   : >> { %2686 = vrot.lane.b32.xlu1 %v2336_v48, %s4526_s27  ;;  %2712 = vrot.lane.b32.xlu0 %v2414_v37, %s4527_s28  ;;  %v2586_v58 = vpop.f32.mrb[45].mxu0  ;;  %v2499_v61 = vpop.f32.mrb[43].mxu1  ;;  %v2585_v31 = vadd.f32 %v2584_v56, %v2505_v2 }
 0x576   : >> { %v2587_v44 = vadd.f32 %v2586_v58, %v2505_v2 }
 0x578   : >> { %v2590_v53 = vpop.f32.mrb[46].mxu0  ;;  %v2661_v54 = vpop.f32.mrb[44].mxu1 }
 0x579   : >> { %v2663_v59 = vpop.f32.mrb[45].mxu1  ;;  %2720 = vrot.lane.b32.xlu0 %v2491_v50, %s4527_s28  ;;  %2714 = vrot.lane.b32.xlu1 %v2420_v45, %s4527_s28  ;;  %v2592_v46 = vpop.f32.mrb[47].mxu0  ;;  %v2662_v21 = vadd.f32 %v2661_v54, %v2505_v2 }
 0x57a   : >> { %v2664_v35 = vadd.f32 %v2663_v59, %v2505_v2 }
 0x57c   : >> { %v5193_v55 = vpop.f32.mrb[46].mxu1 }
 0x57d   : >> { %v5195_v62 = vpop.f32.mrb[47].mxu1  ;;  %2716 = vrot.lane.b32.xlu0 %v2416_v49, %s4527_s28  ;;  %2722 = vrot.lane.b32.xlu1 %v2497_v57, %s4527_s28 }
 0x581   : >> { %2724 = vrot.lane.b32.xlu0 %v2493_v51, %s4527_s28  ;;  %2718 = vrot.lane.b32.xlu1 %v2422_v38, %s4527_s28  ;;  %v2593_v38 = vadd.f32 %v2592_v46, %v5208_v41 }
 0x585   : >> { %3120 = vperm.xlu0 %4469, %v4252_v63   ;;  %2726 = vrot.lane.b32.xlu1 %v2499_v61, %s4527_s28  ;;  %v2591_v63 = vadd.f32 %v2590_v53, %v5208_v41 }
 0x589   : >> { %3125 = vperm.xlu1 %4470, %v4253_v60  }
 0x5d7   : >> { %v2673_v19 = vpop.permute.xlu0 %2672 }
 0x5db   : >> { %v2681_v20 = vpop.permute.xlu0 %2680  ;;  %v2675_v5 = vpop.permute.xlu1 %2674 }
 0x5df   : >> { %v2677_v8 = vpop.permute.xlu0 %2676  ;;  %v2683_v28 = vpop.permute.xlu1 %2682 }
 0x5e0   : >> { %v2692_v33 = vsel %vm846_vm9, %v2673_v19, %v2677_v8  ;;  %v2690_v3 = vsel %vm846_vm9, %v2677_v8, %v2681_v20 }
 0x5e1   : >> { %v2697_v39 = vmul.f32 %v4620_v11, %v2692_v33  ;;  %v2698_v43 = vmul.f32 %v4622_v12, %v2690_v3 }
 0x5e3   : >> { %v2685_v29 = vpop.permute.xlu0 %2684  ;;  %v2679_v22 = vpop.permute.xlu1 %2678  ;;  %v2705_v51 = vadd.f32 %v2697_v39, %v2587_v44  ;;  %v2706_v60 = vadd.f32 %v2698_v43, %v2662_v21  ;;  %v2670_v44 = vadd.f32 %v5195_v62, %v5208_v41 }
 0x5e4   : >> { %v2694_v40 = vsel %vm846_vm9, %v2685_v29, %v2673_v19  ;;  %v2688_v52 = vsel %vm846_vm9, %v2681_v20, %v2685_v29  ;;  %v2693_v6 = vsel %vm846_vm9, %v2675_v5, %v2679_v22  ;;  %v2691_v48 = vsel %vm846_vm9, %v2679_v22, %v2683_v28 }
 0x5e5   : >> { %v2696_v23 = vmul.f32 %v4618_v10, %v2694_v40  ;;  %v2699_v37 = vmul.f32 %v4624_v13, %v2688_v52  ;;  %v2701_v49 = vmul.f32 %v4620_v11, %v2693_v6  ;;  %v2702_v2 = vmul.f32 %v4622_v12, %v2691_v48 }
 0x5e7   : >> { %v2687_v24 = vpop.permute.xlu1 %2686  ;;  %v2713_v32 = vpop.permute.xlu0 %2712  ;;  %v2704_v58 = vadd.f32 %v2696_v23, %v2585_v31  ;;  %v2707_v19 = vadd.f32 %v2699_v37, %v2664_v35  ;;  %v2709_v20 = vadd.f32 %v2701_v49, %v2593_v38  ;;  %v2668_v23 = vadd.f32 %v5193_v55, %v5208_v41 }
 0x5e8   : >> { %v2695_v34 = vsel %vm846_vm9, %v2687_v24, %v2675_v5  ;;  %v2689_v46 = vsel %vm846_vm9, %v2683_v28, %v2687_v24 }
 0x5e9   : >> { %v2700_v61 = vmul.f32 %v4618_v10, %v2695_v34  ;;  %v2703_v28 = vmul.f32 %v4624_v13, %v2689_v46  ;;  %v2710_v48 = vadd.f32 %v2702_v2, %v2668_v23 }
 0x5eb   : >> { %v2721_v25 = vpop.permute.xlu0 %2720  ;;  %v2715_v30 = vpop.permute.xlu1 %2714  ;;  %v2708_v24 = vadd.f32 %v2700_v61, %v2591_v63  ;;  %v2711_v49 = vadd.f32 %v2703_v28, %v2670_v44  ;;  %v4256_v28 = vld [vmem:[%s5644_s2 + $0xa8] sm:$0xff] }
 0x5ef   : >> { %v2717_v45 = vpop.permute.xlu0 %2716  ;;  %v2723_v50 = vpop.permute.xlu1 %2722 }
 0x5f0   : >> { %v2730_v56 = vsel %vm887_vm10, %v2717_v45, %v2721_v25  ;;  %v2732_v57 = vsel %vm887_vm10, %v2713_v32, %v2717_v45 }
 0x5f1   : >> { %v2736_v54 = vmul.f32 %v4626_v14, %v2732_v57  ;;  %v2737_v59 = vmul.f32 %v4628_v15, %v2730_v56 }
 0x5f3   : >> { %v2744_v5 = vadd.f32 %v2736_v54, %v2704_v58  ;;  %v2745_v8 = vadd.f32 %v2737_v59, %v2705_v51  ;;  %v2725_v29 = vpop.permute.xlu0 %2724  ;;  %v2719_v22 = vpop.permute.xlu1 %2718 }
 0x5f4   : >> { %v2728_v33 = vsel %vm887_vm10, %v2721_v25, %v2725_v29  ;;  %v2734_v40 = vsel %vm887_vm10, %v2725_v29, %v2713_v32  ;;  %v2731_v53 = vsel %vm887_vm10, %v2719_v22, %v2723_v50  ;;  %v2733_v3 = vsel %vm887_vm10, %v2715_v30, %v2719_v22 }
 0x5f5   : >> { %v2761_v39 = vmul.f32 %v5222_v42, %v2744_v5  ;;  %v2762_v52 = vmul.f32 %v5222_v42, %v2745_v8  ;;  %v2738_v6 = vmul.f32 %v4630_v16, %v2728_v33  ;;  %v2739_v25 = vmul.f32 %v4632_v17, %v2734_v40  ;;  %v4257_v40 = vld [vmem:[%s5644_s2 + $0x90] sm:$0xff] }
 0x5f6   : >> { %v2740_v31 = vmul.f32 %v4626_v14, %v2733_v3  ;;  %v2741_v32 = vmul.f32 %v4628_v15, %v2731_v53  ;;  %vm2752_vm7 = vcmp.gt.f32.partialorder %v2744_v5, 0.0  ;;  %vm2753_vm8 = vcmp.gt.f32.partialorder %v2745_v8, 0.0  ;;  %v4255_v3 = vld [vmem:[%s5644_s2 + $0xa0] sm:$0xff] }
 0x5f7   : >> { %v2727_v21 = vpop.permute.xlu1 %2726  ;;  %v2746_v43 = vadd.f32 %v2738_v6, %v2706_v60  ;;  %v2747_v34 = vadd.f32 %v2739_v25, %v2707_v19  ;;  %v2769_v51 = vsel %vm2752_vm7, %v2744_v5, %v2761_v39  ;;  %v2770_v41 = vsel %vm2753_vm8, %v2745_v8, %v2762_v52 }
 0x5f8   : >> { %v2748_v35 = vadd.f32 %v2740_v31, %v2708_v24  ;;  %v2749_v37 = vadd.f32 %v2741_v32, %v2709_v20  ;;  %v2729_v45 = vsel %vm887_vm10, %v2723_v50, %v2727_v21  ;;  %v2735_v38 = vsel %vm887_vm10, %v2727_v21, %v2715_v30 }
 0x5f9   : >> { %v2763_v55 = vmul.f32 %v5222_v42, %v2746_v43  ;;  %v2764_v62 = vmul.f32 %v5222_v42, %v2747_v34  ;;  %vm2754_vm13 = vcmp.gt.f32.partialorder %v2746_v43, 0.0  ;;  %vm2755_vm14 = vcmp.gt.f32.partialorder %v2747_v34, 0.0 }
 0x5fa   : >> { %vm2756_vm11 = vcmp.gt.f32.partialorder %v2748_v35, 0.0  ;;  %vm2757_vm12 = vcmp.gt.f32.partialorder %v2749_v37, 0.0  ;;  %v2765_v56 = vmul.f32 %v5222_v42, %v2748_v35  ;;  %v2766_v57 = vmul.f32 %v5222_v42, %v2749_v37 }
 0x5fb   : >> { %v2742_v58 = vmul.f32 %v4630_v16, %v2729_v45  ;;  %v2743_v50 = vmul.f32 %v4632_v17, %v2735_v38  ;;  %v2771_v2 = vsel %vm2754_vm13, %v2746_v43, %v2763_v55  ;;  %v5279_v46 = vadd.f32 %v2770_v41, %v5113_v27 }
 0x5fc   : >> { %v2773_v61 = vsel %vm2756_vm11, %v2748_v35, %v2765_v56  ;;  %v2774_v30 = vsel %vm2757_vm12, %v2749_v37, %v2766_v57  ;;  %v5282_v19 = vadd.f32 %v2769_v51, %v5116_v7  ;;  %v2772_v20 = vsel %vm2755_vm14, %v2747_v34, %v2764_v62 }
 0x5fd   : >> { %v2750_v54 = vadd.f32 %v2742_v58, %v2710_v48  ;;  %v2751_v59 = vadd.f32 %v2743_v50, %v2711_v49  ;;  %v5273_v63 = vadd.f32 %v2774_v30, %v5107_v4  ;;  %v5276_v60 = vadd.f32 %v2773_v61, %v5110_v0  ;;  %v4273_v58 = vld [vmem:[%s5645_s3 + $0x50] sm:$0xff]  ;;  %v4274_v50 = vld [vmem:[%s5645_s3 + $0x58] sm:$0xff] }
 0x5fe   : >> { %v5291_v27 = vadd.f32 %v2772_v20, %v5125_v9  ;;  %v5297_v33 = vadd.f32 %v2771_v2, %v5131_v36  ;;  %v4263_v36 = vld [vmem:[%s5644_s2 + $0xb0] sm:$0xff] }
 0x5ff   : >> { %vm2758_vm15 = vcmp.gt.f32.partialorder %v2750_v54, 0.0  ;;  %vm2759_vm0 = vcmp.gt.f32.partialorder %v2751_v59, 0.0  ;;  %v2767_v5 = vmul.f32 %v5222_v42, %v2750_v54  ;;  %v2768_v8 = vmul.f32 %v5222_v42, %v2751_v59 }
 0x600   : >> { %v4373_v4 = vpack.c.bf16 %v5273_v63, %v5279_v46  ;;  %v4375_v0 = vpack.c.bf16 %v5276_v60, %v5282_v19 }
 0x601   : >> { %v2775_v29 = vsel %vm2758_vm15, %v2750_v54, %v2767_v5  ;;  %v2776_v22 = vsel %vm2759_vm0, %v2751_v59, %v2768_v8 }
 0x602   : >> { %4374 = vmatprep.subr.bf16.mxu0 %v4373_v4  ;;  %v5294_v7 = vadd.f32 %v2776_v22, %v5128_v26  ;;  %v5300_v42 = vadd.f32 %v2775_v29, %v5134_v47  ;;  %v4258_v26 = vld [vmem:[%s5644_s2 + $0x98] sm:$0xff] }
 0x603   : >> { %4376 = vmatpush1.bf16.msra.mxu0 %v4375_v0  ;;  %v4264_v47 = vld [vmem:[%s5644_s2 + $0xb8] sm:$0xff] }
 0x604   : >> { %4382 = vmatprep.subr.bf16.mxu0 %v4373_v4  ;;  %v4377_v53 = vpack.c.bf16 %v5294_v7, %v5291_v27  ;;  %v4379_v9 = vpack.c.bf16 %v5300_v42, %v5297_v33  ;;  %v3121_v61 = vpop.permute.xlu0 %3120 }
 0x606   : >> { %4259 = vmatmul.mubr.msk.f32.vlgmr.msra.gmra.mrb[48].mxu0 %vm946_vm3, %v4257_v40  ;;  %4378 = vmatprep.subr.bf16.mxu1 %v4377_v53 }
 0x607   : >> { %4380 = vmatpush1.bf16.msra.mxu1 %v4379_v9  ;;  %4384 = vmatpush1.bf16.msra.mxu0 %v4375_v0 }
 0x608   : >> { %4386 = vmatprep.subr.bf16.mxu1 %v4377_v53  ;;  %4390 = vmatprep.subr.bf16.mxu0 %v4373_v4  ;;  %v5374_v30 = vpop.permute.xlu1 %3125 }
 0x609   : >> { %2871 = vmatprep.mubr.f32.mxu0 %v4524_v18 }
 0x60a   : >> { %4261 = vmatmul.mubr.msk.f32.vlgmr.msra.gmra.mrb[48].mxu1 %vm946_vm3, %v4257_v40  ;;  %4260 = vmatmul.mubr.msk.f32.gmra.mrb[50].mxu0 %vm946_vm3, %v4258_v26 }
 0x60b   : >> { %4388 = vmatpush1.bf16.msra.mxu1 %v4379_v9  ;;  %2948 = vmatprep.mubr.f32.mxu1 %v4524_v18 }
 0x60c   : >> { %4394 = vmatprep.subr.bf16.mxu1 %v4377_v53  ;;  %3028 = vmatprep.mubr.f32.mxu0 %v4524_v18 }
 0x60e   : >> { %4262 = vmatmul.mubr.msk.f32.gmra.mrb[50].mxu1 %vm946_vm3, %v4258_v26  ;;  %4265 = vmatmul.mubr.msk.f32.vlgmr.msra.gmra.mrb[52].mxu0 %vm946_vm3, %v4263_v36 }
 0x60f   : >> { %4392 = vmatpush1.bf16.msra.mxu0 %v4375_v0  ;;  %3034 = vmatprep.mubr.f32.mxu0 %v4524_v18 }
 0x610   : >> { %3105 = vmatprep.mubr.f32.mxu1 %v4524_v18 }
 0x612   : >> { %4266 = vmatmul.mubr.msk.f32.gmra.mrb[54].mxu0 %vm946_vm3, %v4264_v47  ;;  %4267 = vmatmul.mubr.msk.f32.vlgmr.msra.gmra.mrb[52].mxu1 %vm946_vm3, %v4263_v36 }
 0x613   : >> { %4396 = vmatpush1.bf16.msra.mxu1 %v4379_v9  ;;  %3111 = vmatprep.mubr.f32.mxu1 %v4524_v18 }
 0x614   : >> { %3198 = vmatprep.mubr.f32.mxu0 %v4524_v18 }
 0x616   : >> { %4268 = vmatmul.mubr.msk.f32.gmra.mrb[54].mxu1 %vm946_vm3, %v4264_v47  ;;  %4269 = vmatmul.mubr.msk.f32.vlgmr.msra.gmra.mrb[56].mxu0 %vm946_vm3, %v4255_v3 }
 0x617   : >> { %3204 = vmatprep.mubr.f32.mxu0 %v4524_v18  ;;  %3275 = vmatprep.mubr.f32.mxu1 %v4524_v18 }
 0x61a   : >> { %4270 = vmatmul.mubr.msk.f32.gmra.mrb[58].mxu0 %vm946_vm3, %v4256_v28  ;;  %4271 = vmatmul.mubr.msk.f32.vlgmr.msra.gmra.mrb[56].mxu1 %vm946_vm3, %v4255_v3 }
 0x61b   : >> { %3281 = vmatprep.mubr.f32.mxu1 %v4524_v18  ;;  %3481 = vmatprep.mubr.f32.mxu0 %v4524_v18 }
 0x61e   : >> { %4272 = vmatmul.mubr.msk.f32.gmra.mrb[58].mxu1 %vm946_vm3, %v4256_v28 }
 0x61f   : >> { %3558 = vmatprep.mubr.f32.mxu1 %v4524_v18 }
 0x6d9   : >> { %v2867_v24 = vpop.f32.mrb[48].mxu0 }
 0x6da   : >> { %3288 = vrot.lane.b32.xlu0 %v2867_v24, %s4526_s27  ;;  %v2869_v39 = vpop.f32.mrb[49].mxu0 }
 0x6dd   : >> { %v2873_v52 = vpop.f32.mrb[50].mxu0  ;;  %v2944_v6 = vpop.f32.mrb[48].mxu1 }
 0x6de   : >> { %v2946_v25 = vpop.f32.mrb[49].mxu1  ;;  %3296 = vrot.lane.b32.xlu0 %v2944_v6, %s4526_s27  ;;  %3290 = vrot.lane.b32.xlu1 %v2873_v52, %s4526_s27  ;;  %v2875_v31 = vpop.f32.mrb[51].mxu0 }
 0x6e1   : >> { %v2950_v32 = vpop.f32.mrb[50].mxu1  ;;  %v3030_v23 = vpop.f32.mrb[52].mxu0 }
 0x6e2   : >> { %v2952_v44 = vpop.f32.mrb[51].mxu1  ;;  %3292 = vrot.lane.b32.xlu0 %v2869_v39, %s4526_s27  ;;  %3298 = vrot.lane.b32.xlu1 %v2950_v32, %s4526_s27  ;;  %v3032_v21 = vpop.f32.mrb[53].mxu0  ;;  %v5388_v39 = vstv %s4254_s11 }
 0x6e5   : >> { %v3036_v43 = vpop.f32.mrb[54].mxu0  ;;  %v3107_v34 = vpop.f32.mrb[52].mxu1 }
 0x6e6   : >> { %3300 = vrot.lane.b32.xlu0 %v2946_v25, %s4526_s27  ;;  %3294 = vrot.lane.b32.xlu1 %v2875_v31, %s4526_s27  ;;  %v3038_v35 = vpop.f32.mrb[55].mxu0  ;;  %v3109_v37 = vpop.f32.mrb[53].mxu1 }
 0x6e9   : >> { %v3200_v48 = vpop.f32.mrb[56].mxu0  ;;  %v3113_v49 = vpop.f32.mrb[54].mxu1 }
 0x6ea   : >> { %3302 = vrot.lane.b32.xlu1 %v2952_v44, %s4526_s27  ;;  %3328 = vrot.lane.b32.xlu0 %v3030_v23, %s4527_s28  ;;  %v3202_v45 = vpop.f32.mrb[57].mxu0  ;;  %v3115_v38 = vpop.f32.mrb[55].mxu1  ;;  %v3201_v28 = vadd.f32 %v3200_v48, %v3121_v61 }
 0x6eb   : >> { %v3203_v52 = vadd.f32 %v3202_v45, %v3121_v61 }
 0x6ed   : >> { %v3206_v51 = vpop.f32.mrb[58].mxu0  ;;  %v3277_v55 = vpop.f32.mrb[56].mxu1 }
 0x6ee   : >> { %v3279_v62 = vpop.f32.mrb[57].mxu1  ;;  %3336 = vrot.lane.b32.xlu0 %v3107_v34, %s4527_s28  ;;  %3330 = vrot.lane.b32.xlu1 %v3036_v43, %s4527_s28  ;;  %v3208_v41 = vpop.f32.mrb[59].mxu0  ;;  %v3278_v6 = vadd.f32 %v3277_v55, %v3121_v61 }
 0x6ef   : >> { %v3280_v32 = vadd.f32 %v3279_v62, %v3121_v61 }
 0x6f1   : >> { %v5359_v56 = vpop.f32.mrb[58].mxu1 }
 0x6f2   : >> { %v5361_v57 = vpop.f32.mrb[59].mxu1  ;;  %3332 = vrot.lane.b32.xlu0 %v3032_v21, %s4527_s28  ;;  %3338 = vrot.lane.b32.xlu1 %v3113_v49, %s4527_s28 }
 0x6f6   : >> { %3340 = vrot.lane.b32.xlu0 %v3109_v37, %s4527_s28  ;;  %3334 = vrot.lane.b32.xlu1 %v3038_v35, %s4527_s28  ;;  %v3209_v35 = vadd.f32 %v3208_v41, %v5374_v30 }
 0x6fa   : >> { %3736 = vperm.xlu0 %4469, %v4273_v58   ;;  %3342 = vrot.lane.b32.xlu1 %v3115_v38, %s4527_s28  ;;  %v3207_v58 = vadd.f32 %v3206_v51, %v5374_v30 }
 0x6fe   : >> { %3741 = vperm.xlu1 %4470, %v4274_v50  }
 0x74c   : >> { %v3289_v54 = vpop.permute.xlu0 %3288 }
 0x750   : >> { %v3297_v59 = vpop.permute.xlu0 %3296  ;;  %v3291_v2 = vpop.permute.xlu1 %3290 }
 0x754   : >> { %v3293_v20 = vpop.permute.xlu0 %3292  ;;  %v3299_v5 = vpop.permute.xlu1 %3298 }
 0x755   : >> { %v3308_v22 = vsel %vm846_vm9, %v3289_v54, %v3293_v20  ;;  %v3306_v53 = vsel %vm846_vm9, %v3293_v20, %v3297_v59 }
 0x756   : >> { %v3313_v36 = vmul.f32 %v4620_v11, %v3308_v22  ;;  %v3314_v25 = vmul.f32 %v4622_v12, %v3306_v53 }
 0x758   : >> { %v3301_v8 = vpop.permute.xlu0 %3300  ;;  %v3295_v4 = vpop.permute.xlu1 %3294  ;;  %v3321_v37 = vadd.f32 %v3313_v36, %v3203_v52  ;;  %v3322_v50 = vadd.f32 %v3314_v25, %v3278_v6  ;;  %v3286_v52 = vadd.f32 %v5361_v57, %v5374_v30 }
 0x759   : >> { %v3310_v40 = vsel %vm846_vm9, %v3301_v8, %v3289_v54  ;;  %v3304_v47 = vsel %vm846_vm9, %v3297_v59, %v3301_v8  ;;  %v3309_v3 = vsel %vm846_vm9, %v3291_v2, %v3295_v4  ;;  %v3307_v44 = vsel %vm846_vm9, %v3295_v4, %v3299_v5 }
 0x75a   : >> { %v3312_v24 = vmul.f32 %v4618_v10, %v3310_v40  ;;  %v3315_v23 = vmul.f32 %v4624_v13, %v3304_v47  ;;  %v3317_v21 = vmul.f32 %v4620_v11, %v3309_v3  ;;  %v3318_v61 = vmul.f32 %v4622_v12, %v3307_v44 }
 0x75c   : >> { %v3303_v0 = vpop.permute.xlu1 %3302  ;;  %v3329_v29 = vpop.permute.xlu0 %3328  ;;  %v3320_v45 = vadd.f32 %v3312_v24, %v3201_v28  ;;  %v3323_v54 = vadd.f32 %v3315_v23, %v3280_v32  ;;  %v3325_v59 = vadd.f32 %v3317_v21, %v3209_v35  ;;  %v3284_v24 = vadd.f32 %v5359_v56, %v5374_v30 }
 0x75d   : >> { %v3311_v31 = vsel %vm846_vm9, %v3303_v0, %v3291_v2  ;;  %v3305_v41 = vsel %vm846_vm9, %v3299_v5, %v3303_v0 }
 0x75e   : >> { %v3316_v38 = vmul.f32 %v4618_v10, %v3311_v31  ;;  %v3319_v5 = vmul.f32 %v4624_v13, %v3305_v41  ;;  %v3326_v44 = vadd.f32 %v3318_v61, %v3284_v24 }
 0x760   : >> { %v3337_v9 = vpop.permute.xlu0 %3336  ;;  %v3331_v26 = vpop.permute.xlu1 %3330  ;;  %v3324_v0 = vadd.f32 %v3316_v38, %v3207_v58  ;;  %v3327_v21 = vadd.f32 %v3319_v5, %v3286_v52  ;;  %v4277_v5 = vld [vmem:[%s5644_s2 + $0xd8] sm:$0xff] }
 0x764   : >> { %v3333_v43 = vpop.permute.xlu0 %3332  ;;  %v3339_v34 = vpop.permute.xlu1 %3338 }
 0x765   : >> { %v3346_v48 = vsel %vm887_vm10, %v3333_v43, %v3337_v9  ;;  %v3348_v49 = vsel %vm887_vm10, %v3329_v29, %v3333_v43 }
 0x766   : >> { %v3352_v55 = vmul.f32 %v4626_v14, %v3348_v49  ;;  %v3353_v62 = vmul.f32 %v4628_v15, %v3346_v48 }
 0x768   : >> { %v3360_v2 = vadd.f32 %v3352_v55, %v3320_v45  ;;  %v3361_v20 = vadd.f32 %v3353_v62, %v3321_v37  ;;  %v3341_v8 = vpop.permute.xlu0 %3340  ;;  %v3335_v4 = vpop.permute.xlu1 %3334 }
 0x769   : >> { %v3344_v22 = vsel %vm887_vm10, %v3337_v9, %v3341_v8  ;;  %v3350_v40 = vsel %vm887_vm10, %v3341_v8, %v3329_v29  ;;  %v3347_v51 = vsel %vm887_vm10, %v3335_v4, %v3339_v34  ;;  %v3349_v53 = vsel %vm887_vm10, %v3331_v26, %v3335_v4 }
 0x76a   : >> { %v3377_v36 = vmul.f32 %v5388_v39, %v3360_v2  ;;  %v3378_v47 = vmul.f32 %v5388_v39, %v3361_v20  ;;  %v3354_v3 = vmul.f32 %v4630_v16, %v3344_v22  ;;  %v3355_v9 = vmul.f32 %v4632_v17, %v3350_v40  ;;  %v4278_v40 = vld [vmem:[%s5644_s2 + $0xc0] sm:$0xff] }
 0x76b   : >> { %v3356_v28 = vmul.f32 %v4626_v14, %v3349_v53  ;;  %v3357_v29 = vmul.f32 %v4628_v15, %v3347_v51  ;;  %vm3368_vm1 = vcmp.gt.f32.partialorder %v3360_v2, 0.0  ;;  %vm3369_vm2 = vcmp.gt.f32.partialorder %v3361_v20, 0.0  ;;  %v4276_v53 = vld [vmem:[%s5644_s2 + $0xd0] sm:$0xff] }
 0x76c   : >> { %v3343_v6 = vpop.permute.xlu1 %3342  ;;  %v3362_v25 = vadd.f32 %v3354_v3, %v3322_v50  ;;  %v3363_v31 = vadd.f32 %v3355_v9, %v3323_v54  ;;  %v3385_v37 = vsel %vm3368_vm1, %v3360_v2, %v3377_v36  ;;  %v3386_v30 = vsel %vm3369_vm2, %v3361_v20, %v3378_v47 }
 0x76d   : >> { %v3364_v32 = vadd.f32 %v3356_v28, %v3324_v0  ;;  %v3365_v23 = vadd.f32 %v3357_v29, %v3325_v59  ;;  %v3345_v43 = vsel %vm887_vm10, %v3339_v34, %v3343_v6  ;;  %v3351_v35 = vsel %vm887_vm10, %v3343_v6, %v3331_v26 }
 0x76e   : >> { %v3379_v56 = vmul.f32 %v5388_v39, %v3362_v25  ;;  %v3380_v57 = vmul.f32 %v5388_v39, %v3363_v31  ;;  %vm3370_vm6 = vcmp.gt.f32.partialorder %v3362_v25, 0.0  ;;  %vm3371_vm7 = vcmp.gt.f32.partialorder %v3363_v31, 0.0 }
 0x76f   : >> { %vm3372_vm4 = vcmp.gt.f32.partialorder %v3364_v32, 0.0  ;;  %vm3373_vm5 = vcmp.gt.f32.partialorder %v3365_v23, 0.0  ;;  %v3381_v48 = vmul.f32 %v5388_v39, %v3364_v32  ;;  %v3382_v49 = vmul.f32 %v5388_v39, %v3365_v23 }
 0x770   : >> { %v3358_v45 = vmul.f32 %v4630_v16, %v3345_v43  ;;  %v3359_v34 = vmul.f32 %v4632_v17, %v3351_v35  ;;  %v3387_v61 = vsel %vm3370_vm6, %v3362_v25, %v3379_v56  ;;  %v5445_v41 = vadd.f32 %v3386_v30, %v5279_v46 }
 0x771   : >> { %v3389_v38 = vsel %vm3372_vm4, %v3364_v32, %v3381_v48  ;;  %v3390_v26 = vsel %vm3373_vm5, %v3365_v23, %v3382_v49  ;;  %v5448_v54 = vadd.f32 %v3385_v37, %v5282_v19  ;;  %v3388_v59 = vsel %vm3371_vm7, %v3363_v31, %v3380_v57 }
 0x772   : >> { %v3366_v55 = vadd.f32 %v3358_v45, %v3326_v44  ;;  %v3367_v62 = vadd.f32 %v3359_v34, %v3327_v21  ;;  %v5439_v58 = vadd.f32 %v3390_v26, %v5273_v63  ;;  %v5442_v50 = vadd.f32 %v3389_v38, %v5276_v60 }
 0x773   : >> { %v5457_v46 = vadd.f32 %v3388_v59, %v5291_v27  ;;  %v5463_v22 = vadd.f32 %v3387_v61, %v5297_v33  ;;  %v4284_v33 = vld [vmem:[%s5644_s2 + $0xe0] sm:$0xff] }
 0x774   : >> { %vm3374_vm8 = vcmp.gt.f32.partialorder %v3366_v55, 0.0  ;;  %vm3375_vm11 = vcmp.gt.f32.partialorder %v3367_v62, 0.0  ;;  %v3383_v2 = vmul.f32 %v5388_v39, %v3366_v55  ;;  %v3384_v20 = vmul.f32 %v5388_v39, %v3367_v62 }
 0x775   : >> { %v4397_v63 = vpack.c.bf16 %v5439_v58, %v5445_v41  ;;  %v4399_v60 = vpack.c.bf16 %v5442_v50, %v5448_v54 }
 0x776   : >> { %v3391_v8 = vsel %vm3374_vm8, %v3366_v55, %v3383_v2  ;;  %v3392_v4 = vsel %vm3375_vm11, %v3367_v62, %v3384_v20 }
 0x777   : >> { %4398 = vmatprep.subr.bf16.mxu0 %v4397_v63  ;;  %v5460_v19 = vadd.f32 %v3392_v4, %v5294_v7  ;;  %v5466_v39 = vadd.f32 %v3391_v8, %v5300_v42  ;;  %v4279_v7 = vld [vmem:[%s5644_s2 + $0xc8] sm:$0xff] }
 0x778   : >> { %4400 = vmatpush1.bf16.msra.mxu0 %v4399_v60  ;;  %v4285_v42 = vld [vmem:[%s5644_s2 + $0xe8] sm:$0xff] }
 0x779   : >> { %4406 = vmatprep.subr.bf16.mxu0 %v4397_v63  ;;  %v4401_v51 = vpack.c.bf16 %v5460_v19, %v5457_v46  ;;  %v4403_v27 = vpack.c.bf16 %v5466_v39, %v5463_v22  ;;  %v3737_v49 = vpop.permute.xlu0 %3736 }
 0x77b   : >> { %4280 = vmatmul.mubr.msk.f32.vlgmr.msra.gmra.mrb[60].mxu0 %vm946_vm3, %v4278_v40  ;;  %4402 = vmatprep.subr.bf16.mxu1 %v4401_v51 }
 0x77c   : >> { %4404 = vmatpush1.bf16.msra.mxu1 %v4403_v27  ;;  %4408 = vmatpush1.bf16.msra.mxu0 %v4399_v60 }
 0x77d   : >> { %4410 = vmatprep.subr.bf16.mxu1 %v4401_v51  ;;  %4414 = vmatprep.subr.bf16.mxu0 %v4397_v63  ;;  %v3742_v45 = vpop.permute.xlu1 %3741 }
 0x77e   : >> { %3487 = vmatprep.mubr.f32.mxu0 %v4524_v18 }
 0x77f   : >> { %4282 = vmatmul.mubr.msk.f32.vlgmr.msra.gmra.mrb[60].mxu1 %vm946_vm3, %v4278_v40  ;;  %4281 = vmatmul.mubr.msk.f32.gmra.mrb[62].mxu0 %vm946_vm3, %v4279_v7 }
 0x780   : >> { %4412 = vmatpush1.bf16.msra.mxu1 %v4403_v27  ;;  %3564 = vmatprep.mubr.f32.mxu1 %v4524_v18 }
 0x781   : >> { %4418 = vmatprep.subr.bf16.mxu1 %v4401_v51  ;;  %3644 = vmatprep.mubr.f32.mxu0 %v4524_v18 }
 0x783   : >> { %4283 = vmatmul.mubr.msk.f32.gmra.mrb[62].mxu1 %vm946_vm3, %v4279_v7  ;;  %4286 = vmatmul.mubr.msk.f32.vlgmr.msra.gmra.mrb[64].mxu0 %vm946_vm3, %v4284_v33 }
 0x784   : >> { %4416 = vmatpush1.bf16.msra.mxu0 %v4399_v60  ;;  %3650 = vmatprep.mubr.f32.mxu0 %v4524_v18 }
 0x785   : >> { %3721 = vmatprep.mubr.f32.mxu1 %v4524_v18 }
 0x787   : >> { %4287 = vmatmul.mubr.msk.f32.gmra.mrb[66].mxu0 %vm946_vm3, %v4285_v42  ;;  %4288 = vmatmul.mubr.msk.f32.vlgmr.msra.gmra.mrb[64].mxu1 %vm946_vm3, %v4284_v33 }
 0x788   : >> { %4420 = vmatpush1.bf16.msra.mxu1 %v4403_v27  ;;  %3727 = vmatprep.mubr.f32.mxu1 %v4524_v18 }
 0x789   : >> { %3814 = vmatprep.mubr.f32.mxu0 %v4524_v18 }
 0x78b   : >> { %4289 = vmatmul.mubr.msk.f32.gmra.mrb[66].mxu1 %vm946_vm3, %v4285_v42  ;;  %4290 = vmatmul.mubr.msk.f32.vlgmr.msra.gmra.mrb[68].mxu0 %vm946_vm3, %v4276_v53 }
 0x78c   : >> { %3820 = vmatprep.mubr.f32.mxu0 %v4524_v18  ;;  %3891 = vmatprep.mubr.f32.mxu1 %v4524_v18 }
 0x78f   : >> { %4291 = vmatmul.mubr.msk.f32.gmra.mrb[70].mxu0 %vm946_vm3, %v4277_v5  ;;  %4292 = vmatmul.mubr.msk.f32.vlgmr.msra.gmra.mrb[68].mxu1 %vm946_vm3, %v4276_v53 }
 0x790   : >> { %3897 = vmatprep.mubr.f32.mxu1 %v4524_v18 }
 0x793   : >> { %4293 = vmatmul.mubr.msk.f32.gmra.mrb[70].mxu1 %vm946_vm3, %v4277_v5 }
 0x84e   : >> { %v3483_v0 = vpop.f32.mrb[60].mxu0 }
 0x84f   : >> { %3904 = vrot.lane.b32.xlu0 %v3483_v0, %s4526_s27  ;;  %v3485_v36 = vpop.f32.mrb[61].mxu0 }
 0x852   : >> { %v3489_v47 = vpop.f32.mrb[62].mxu0  ;;  %v3560_v3 = vpop.f32.mrb[60].mxu1 }
 0x853   : >> { %3912 = vrot.lane.b32.xlu0 %v3560_v3, %s4526_s27  ;;  %3906 = vrot.lane.b32.xlu1 %v3489_v47, %s4526_s27  ;;  %v3562_v9 = vpop.f32.mrb[61].mxu1  ;;  %v3491_v28 = vpop.f32.mrb[63].mxu0 }
 0x856   : >> { %v3566_v29 = vpop.f32.mrb[62].mxu1  ;;  %v3646_v24 = vpop.f32.mrb[64].mxu0 }
 0x857   : >> { %3908 = vrot.lane.b32.xlu0 %v3485_v36, %s4526_s27  ;;  %3914 = vrot.lane.b32.xlu1 %v3566_v29, %s4526_s27  ;;  %v3568_v18 = vpop.f32.mrb[63].mxu1  ;;  %v3648_v52 = vpop.f32.mrb[65].mxu0 }
 0x85a   : >> { %v3652_v6 = vpop.f32.mrb[66].mxu0  ;;  %v3723_v25 = vpop.f32.mrb[64].mxu1 }
 0x85b   : >> { %3916 = vrot.lane.b32.xlu0 %v3562_v9, %s4526_s27  ;;  %3910 = vrot.lane.b32.xlu1 %v3491_v28, %s4526_s27  ;;  %v3654_v31 = vpop.f32.mrb[67].mxu0  ;;  %v3725_v32 = vpop.f32.mrb[65].mxu1 }
 0x85e   : >> { %v3816_v23 = vpop.f32.mrb[68].mxu0  ;;  %v3729_v44 = vpop.f32.mrb[66].mxu1 }
 0x85f   : >> { %3918 = vrot.lane.b32.xlu1 %v3568_v18, %s4526_s27  ;;  %3944 = vrot.lane.b32.xlu0 %v3646_v24, %s4527_s28  ;;  %v3818_v21 = vpop.f32.mrb[69].mxu0  ;;  %v3731_v43 = vpop.f32.mrb[67].mxu1  ;;  %s4275_s27 = sld [smem:[#allocation2 + $0x5]]  ;;  %v3817_v33 = vadd.f32 %v3816_v23, %v3737_v49 }
 0x860   : >> { %v3819_v42 = vadd.f32 %v3818_v21, %v3737_v49 }
 0x862   : >> { %v3822_v35 = vpop.f32.mrb[70].mxu0  ;;  %v3893_v37 = vpop.f32.mrb[68].mxu1 }
 0x863   : >> { %v3895_v56 = vpop.f32.mrb[69].mxu1  ;;  %3952 = vrot.lane.b32.xlu0 %v3723_v25, %s4527_s28  ;;  %3946 = vrot.lane.b32.xlu1 %v3652_v6, %s4527_s28  ;;  %v3824_v57 = vpop.f32.mrb[71].mxu0  ;;  %v3823_v5 = vadd.f32 %v3822_v35, %v3742_v45  ;;  %v3894_v0 = vadd.f32 %v3893_v37, %v3737_v49 }
 0x864   : >> { %v3896_v24 = vadd.f32 %v3895_v56, %v3737_v49  ;;  %v3825_v18 = vadd.f32 %v3824_v57, %v3742_v45 }
 0x865   : >> { %v5540_v53 = vstv %s4275_s27 }
 0x866   : >> { %v3899_v30 = vpop.f32.mrb[70].mxu1 }
 0x867   : >> { %v3901_v48 = vpop.f32.mrb[71].mxu1  ;;  %3948 = vrot.lane.b32.xlu0 %v3648_v52, %s4527_s28  ;;  %3954 = vrot.lane.b32.xlu1 %v3729_v44, %s4527_s28  ;;  %v3900_v52 = vadd.f32 %v3899_v30, %v3742_v45 }
 0x868   : >> { %v3902_v6 = vadd.f32 %v3901_v48, %v3742_v45 }
 0x86b   : >> { %3956 = vrot.lane.b32.xlu0 %v3725_v32, %s4527_s28  ;;  %3950 = vrot.lane.b32.xlu1 %v3654_v31, %s4527_s28 }
 0x86f   : >> { %3958 = vrot.lane.b32.xlu1 %v3731_v43, %s4527_s28  ;;  %s5577_s28 = scalar_lea.vmem %s4634_s15, %s4174_s24 [#allocation4] }
 0x8c1   : >> { %v3905_v34 = vpop.permute.xlu0 %3904 }
 0x8c5   : >> { %v3913_v38 = vpop.permute.xlu0 %3912  ;;  %v3907_v26 = vpop.permute.xlu1 %3906 }
 0x8c9   : >> { %v3909_v55 = vpop.permute.xlu0 %3908  ;;  %v3915_v62 = vpop.permute.xlu1 %3914 }
 0x8ca   : >> { %v3924_v63 = vsel %vm846_vm9, %v3905_v34, %v3909_v55  ;;  %v3922_v8 = vsel %vm846_vm9, %v3909_v55, %v3913_v38 }
 0x8cb   : >> { %v3929_v36 = vmul.f32 %v4620_v11, %v3924_v63  ;;  %v3930_v3 = vmul.f32 %v4622_v12, %v3922_v8 }
 0x8cd   : >> { %v3917_v61 = vpop.permute.xlu0 %3916  ;;  %v3911_v59 = vpop.permute.xlu1 %3910  ;;  %v3937_v43 = vadd.f32 %v3929_v36, %v3819_v42  ;;  %v3938_v57 = vadd.f32 %v3930_v3, %v3894_v0 }
 0x8ce   : >> { %v3926_v60 = vsel %vm846_vm9, %v3917_v61, %v3905_v34  ;;  %v3920_v4 = vsel %vm846_vm9, %v3913_v38, %v3917_v61  ;;  %v3923_v40 = vsel %vm846_vm9, %v3911_v59, %v3915_v62  ;;  %v3925_v51 = vsel %vm846_vm9, %v3907_v26, %v3911_v59 }
 0x8cf   : >> { %v3928_v47 = vmul.f32 %v4618_v10, %v3926_v60  ;;  %v3931_v9 = vmul.f32 %v4624_v13, %v3920_v4  ;;  %v3933_v28 = vmul.f32 %v4620_v11, %v3925_v51  ;;  %v3934_v29 = vmul.f32 %v4622_v12, %v3923_v40 }
 0x8d1   : >> { %v3919_v2 = vpop.permute.xlu1 %3918  ;;  %v3945_v20 = vpop.permute.xlu0 %3944  ;;  %v3936_v35 = vadd.f32 %v3928_v47, %v3817_v33  ;;  %v3939_v30 = vadd.f32 %v3931_v9, %v3896_v24  ;;  %v3941_v48 = vadd.f32 %v3933_v28, %v3825_v18  ;;  %v3942_v49 = vadd.f32 %v3934_v29, %v3900_v52 }
 0x8d2   : >> { %v3921_v32 = vsel %vm846_vm9, %v3915_v62, %v3919_v2  ;;  %v3927_v23 = vsel %vm846_vm9, %v3919_v2, %v3907_v26 }
 0x8d3   : >> { %v3932_v45 = vmul.f32 %v4618_v10, %v3927_v23  ;;  %v3935_v34 = vmul.f32 %v4624_v13, %v3921_v32 }
 0x8d5   : >> { %v3953_v27 = vpop.permute.xlu0 %3952  ;;  %v3947_v7 = vpop.permute.xlu1 %3946  ;;  %v3943_v33 = vadd.f32 %v3935_v34, %v3902_v6 }
 0x8d9   : >> { %v3949_v25 = vpop.permute.xlu0 %3948  ;;  %v3955_v31 = vpop.permute.xlu1 %3954 }
 0x8da   : >> { %v3962_v44 = vsel %vm887_vm10, %v3949_v25, %v3953_v27  ;;  %v3964_v21 = vsel %vm887_vm10, %v3945_v20, %v3949_v25 }
 0x8db   : >> { %v3968_v37 = vmul.f32 %v4626_v14, %v3964_v21  ;;  %v3969_v56 = vmul.f32 %v4628_v15, %v3962_v44 }
 0x8dd   : >> { %v3976_v38 = vadd.f32 %v3968_v37, %v3936_v35  ;;  %v3977_v26 = vadd.f32 %v3969_v56, %v3937_v43  ;;  %v3957_v55 = vpop.permute.xlu0 %3956  ;;  %v3951_v62 = vpop.permute.xlu1 %3950 }
 0x8de   : >> { %v3960_v61 = vsel %vm887_vm10, %v3953_v27, %v3957_v55  ;;  %v3966_v59 = vsel %vm887_vm10, %v3957_v55, %v3945_v20  ;;  %v3963_v2 = vsel %vm887_vm10, %v3951_v62, %v3955_v31  ;;  %v3965_v63 = vsel %vm887_vm10, %v3947_v7, %v3951_v62 }
 0x8df   : >> { %vm3984_vm9 = vcmp.gt.f32.partialorder %v3976_v38, 0.0  ;;  %vm3985_vm3 = vcmp.gt.f32.partialorder %v3977_v26, 0.0  ;;  %v3993_v60 = vmul.f32 %v5540_v53, %v3976_v38  ;;  %v3994_v8 = vmul.f32 %v5540_v53, %v3977_v26 }
 0x8e0   : >> { %v3970_v4 = vmul.f32 %v4630_v16, %v3960_v61  ;;  %v3971_v40 = vmul.f32 %v4632_v17, %v3966_v59  ;;  %v3972_v51 = vmul.f32 %v4626_v14, %v3965_v63  ;;  %v3973_v20 = vmul.f32 %v4628_v15, %v3963_v2 }
 0x8e1   : >> { %v3940_v27 = vadd.f32 %v3932_v45, %v3823_v5  ;;  %v4001_v42 = vsel %vm3984_vm9, %v3976_v38, %v3993_v60  ;;  %v4002_v0 = vsel %vm3985_vm3, %v3977_v26, %v3994_v8  ;;  %v3959_v36 = vpop.permute.xlu1 %3958 }
 0x8e2   : >> { %v4009_v47 = vadd.f32 %v4001_v42, %v5448_v54  ;;  %v4010_v3 = vadd.f32 %v4002_v0, %v5445_v41  ;;  %v3978_v9 = vadd.f32 %v3970_v4, %v3938_v57  ;;  %v3979_v28 = vadd.f32 %v3971_v40, %v3939_v30 }
 0x8e3   : >> { %v3980_v29 = vadd.f32 %v3972_v51, %v3940_v27  ;;  %v3981_v24 = vadd.f32 %v3973_v20, %v3941_v48  ;;  %v3961_v18 = vsel %vm887_vm10, %v3955_v31, %v3959_v36  ;;  %v3967_v52 = vsel %vm887_vm10, %v3959_v36, %v3947_v7 }
 0x8e4   : >> { %4019 = vst [vmem:[%s5577_s28] sm:$0xff] %v4009_v47  ;;  %4020 = vst [vmem:[%s5577_s28 + $0x8] sm:$0xff] %v4010_v3  ;;  %vm3986_vm12 = vcmp.gt.f32.partialorder %v3978_v9, 0.0  ;;  %vm3987_vm13 = vcmp.gt.f32.partialorder %v3979_v28, 0.0  ;;  %v3995_v5 = vmul.f32 %v5540_v53, %v3978_v9  ;;  %v3996_v54 = vmul.f32 %v5540_v53, %v3979_v28 }
 0x8e5   : >> { %vm3988_vm14 = vcmp.gt.f32.partialorder %v3980_v29, 0.0  ;;  %vm3989_vm15 = vcmp.gt.f32.partialorder %v3981_v24, 0.0  ;;  %v3997_v41 = vmul.f32 %v5540_v53, %v3980_v29  ;;  %v3998_v6 = vmul.f32 %v5540_v53, %v3981_v24 }
 0x8e6   : >> { %v4003_v25 = vsel %vm3986_vm12, %v3978_v9, %v3995_v5  ;;  %v4004_v7 = vsel %vm3987_vm13, %v3979_v28, %v3996_v54  ;;  %v3974_v31 = vmul.f32 %v4630_v16, %v3961_v18  ;;  %v3975_v32 = vmul.f32 %v4632_v17, %v3967_v52 }
 0x8e7   : >> { %v4011_v23 = vadd.f32 %v4003_v25, %v5463_v22  ;;  %v4012_v44 = vadd.f32 %v4004_v7, %v5457_v46  ;;  %v4005_v21 = vsel %vm3988_vm14, %v3980_v29, %v3997_v41  ;;  %v4006_v43 = vsel %vm3989_vm15, %v3981_v24, %v3998_v6 }
 0x8e8   : >> { %v4013_v35 = vadd.f32 %v4005_v21, %v5442_v50  ;;  %v4014_v37 = vadd.f32 %v4006_v43, %v5439_v58  ;;  %v3982_v56 = vadd.f32 %v3974_v31, %v3942_v49  ;;  %v3983_v57 = vadd.f32 %v3975_v32, %v3943_v33 }
 0x8e9   : >> { %4021 = vst [vmem:[%s5577_s28 + $0x10] sm:$0xff] %v4011_v23  ;;  %4022 = vst [vmem:[%s5577_s28 + $0x18] sm:$0xff] %v4012_v44  ;;  %317 = sbr.rel (!%p315_p6) target bundleno = 46 (0x2e), region = 128 }
 0x8ea   : >> { %4023 = vst [vmem:[%s5577_s28 + $0x40] sm:$0xff] %v4013_v35  ;;  %4024 = vst [vmem:[%s5577_s28 + $0x48] sm:$0xff] %v4014_v37  ;;  %vm3990_vm10 = vcmp.gt.f32.partialorder %v3982_v56, 0.0  ;;  %vm3991_vm0 = vcmp.gt.f32.partialorder %v3983_v57, 0.0  ;;  %v3999_v22 = vmul.f32 %v5540_v53, %v3982_v56  ;;  %v4000_v46 = vmul.f32 %v5540_v53, %v3983_v57 }
 0x8ec   : >> { %v4007_v30 = vsel %vm3990_vm10, %v3982_v56, %v3999_v22  ;;  %v4008_v48 = vsel %vm3991_vm0, %v3983_v57, %v4000_v46 }
 0x8ed   : >> { %v4015_v50 = vadd.f32 %v4007_v30, %v5466_v39  ;;  %v4016_v45 = vadd.f32 %v4008_v48, %v5460_v19 }
 0x8ef   : >> { %4025 = vst [vmem:[%s5577_s28 + $0x50] sm:$0xff] %v4015_v50  ;;  %4026 = vst [vmem:[%s5577_s28 + $0x58] sm:$0xff] %v4016_v45 }
 0x8f0   : > { %4033 = sbr.rel (!%p4583_p4) target bundleno = 2304 (0x900), region = 55  ;;  %s4300_s23 = sshll.u32 (%p4583_p4), %s4571_s21, 6 }
 0x8f1   : > { %s4036_s14 = scalar_lea.vmem (%p4583_p4), %s5647_s5, %s4300_s23 }
 0x8f6   : > { %v4049_v58 = vld [vmem:[%s4634_s15] sm:$0xff] (%p4583_p4)  ;;  %v4051_v19 = vld [vmem:[%s4634_s15 + $0x8] sm:$0xff] (%p4583_p4)  ;;  %v4053_v39 = vld [vmem:[%s4634_s15 + $0x10] sm:$0xff] (%p4583_p4) }
 0x8f7   : > { %v4055_v1 = vld [vmem:[%s4634_s15 + $0x18] sm:$0xff]  ;;  %v4057_v10 = vld [vmem:[%s4634_s15 + $0x20] sm:$0xff]  ;;  %v4059_v11 = vld [vmem:[%s4634_s15 + $0x28] sm:$0xff]  ;;  %4050 = vst [vmem:[%s4036_s14] sm:$0xff] %v4049_v58 }
 0x8f8   : > { %4052 = vst [vmem:[%s4036_s14 + $0x8] sm:$0xff] %v4051_v19  ;;  %4054 = vst [vmem:[%s4036_s14 + $0x10] sm:$0xff] %v4053_v39  ;;  %v4061_v12 = vld [vmem:[%s4634_s15 + $0x30] sm:$0xff]  ;;  %v4063_v13 = vld [vmem:[%s4634_s15 + $0x38] sm:$0xff] }
 0x8f9   : > { %4056 = vst [vmem:[%s4036_s14 + $0x18] sm:$0xff] %v4055_v1  ;;  %4058 = vst [vmem:[%s4036_s14 + $0x20] sm:$0xff] %v4057_v10  ;;  %v4065_v14 = vld [vmem:[%s4634_s15 + $0x40] sm:$0xff]  ;;  %v4067_v15 = vld [vmem:[%s4634_s15 + $0x48] sm:$0xff] }
 0x8fa   : > { %4060 = vst [vmem:[%s4036_s14 + $0x28] sm:$0xff] %v4059_v11  ;;  %4062 = vst [vmem:[%s4036_s14 + $0x30] sm:$0xff] %v4061_v12  ;;  %v4069_v16 = vld [vmem:[%s4634_s15 + $0x50] sm:$0xff]  ;;  %v4071_v17 = vld [vmem:[%s4634_s15 + $0x58] sm:$0xff] }
 0x8fb   : > { %4064 = vst [vmem:[%s4036_s14 + $0x38] sm:$0xff] %v4063_v13  ;;  %4066 = vst [vmem:[%s4036_s14 + $0x80] sm:$0xff] %v4065_v14  ;;  %v4073_v53 = vld [vmem:[%s4634_s15 + $0x60] sm:$0xff]  ;;  %v4075_v49 = vld [vmem:[%s4634_s15 + $0x68] sm:$0xff] }
 0x8fc   : > { %4068 = vst [vmem:[%s4036_s14 + $0x88] sm:$0xff] %v4067_v15  ;;  %4070 = vst [vmem:[%s4036_s14 + $0x90] sm:$0xff] %v4069_v16  ;;  %v4077_v34 = vld [vmem:[%s4634_s15 + $0x70] sm:$0xff]  ;;  %v4079_v38 = vld [vmem:[%s4634_s15 + $0x78] sm:$0xff] }
 0x8fd   : > { %4072 = vst [vmem:[%s4036_s14 + $0x98] sm:$0xff] %v4071_v17  ;;  %4074 = vst [vmem:[%s4036_s14 + $0xa0] sm:$0xff] %v4073_v53 }
 0x8fe   : > { %4076 = vst [vmem:[%s4036_s14 + $0xa8] sm:$0xff] %v4075_v49  ;;  %4078 = vst [vmem:[%s4036_s14 + $0xb0] sm:$0xff] %v4077_v34 }
 0x8ff   : > { %4080 = vst [vmem:[%s4036_s14 + $0xb8] sm:$0xff] %v4079_v38 }
 0x900 PF: > { %p13_p4 = scmp.ge.s32.totalorder %s4573_s22, 4   ;;  %s5650_s18 = smov %s4512_s19 }
 0x901   : > { %s5651_s19 = smov %s4581_s25  ;;  %s5652_s20 = smov %s4573_s22 }
 0x902   :  { %15 = sbr.rel (!%p13_p4) target bundleno = 2 (0x2), region = 139 }
 0x909   :  { %4096 = vsyncpa [#allocation3], 1 }
 0x90a   :  { %4098 = vsyncpa [#allocation3 + $0x1], 1 }

</bundles_post_ra>
